<compile_context>
chip_gen: v7x
topology: tpu7x:2x2x1
jax: 0.10.0
libtpu: 0.0.40
codegen_flags: <defaults>
</compile_context>

<pallas_src>
import functools

import jax
import jax.numpy as jnp
from jax import lax
from jax.experimental import pallas as pl
from jax.experimental.pallas import tpu as pltpu

EPS = 1e-5          # torch.nn.InstanceNorm2d default eps
LANE = 128
SUBLANE = 8


def _round_up(x, m):
    return ((x + m - 1) // m) * m


# ----------------------------- Pallas kernel --------------------------------

def _upconv_megafused_kernel(from_up_ref, from_down_ref, gemm_ref,
                             up_w_ref, up_b_ref, c1_w_ref, c1_b_ref,
                             *rest, n_blocks, leaky, residual, e_true):
    """Whole UpConv forward for one batch element (batch dim squeezed off refs).

      from_up_ref   : (Cin_pad, E)      bf16  central edge features (up path)
      from_down_ref : (Cout, E)         bf16  skip-connection features
      gemm_ref      : (4, E)            int32 neighbor ids (a,b,c,d), -1 = none
      up_w_ref      : (Cout, 5*Cin_pad) bf16  pre-stacked MeshConv weight
      c1_w_ref      : (Cout, 5*2*Cout)  bf16  (acts on cat([x1, from_down]))
      *_b_ref       : (Cout, 1)         f32   biases
      rest          : [c2_w_0, c2_b_0, ..., c2_w_{n-1}, c2_b_{n-1}, out_ref]
      out_ref       : (Cout, E)         f32   lane-dense on the edge axis
    """
    out_ref = rest[-1]
    c2_refs = rest[:-1]
    E = gemm_ref.shape[-1]
    f32 = jnp.float32

    # --- one-hot GeMM selection matrices (built once, reused by all stages) --
    # sel_k[r, e] = 1 iff gemm[k, e] == r ; a missing neighbor (-1) gives an
    # all-zero column, reproducing MeshCNN's zero-padded gather exactly.
    idx = gemm_ref[...]                                          # (4, E) int32
    rows = lax.broadcasted_iota(jnp.int32, (E, E), 0)

    def sel(k):
        return jnp.where(rows == idx[k:k + 1, :], 1.0, 0.0).astype(f32)

    s_a, s_b, s_c, s_d = sel(0), sel(1), sel(2), sel(3)
    m_ac, m_bd = s_a + s_c, s_b + s_d            # gathers for a+c and b+d
    m_amc, m_bmd = s_a - s_c, s_b - s_d          # gathers for a-c and b-d

    def mesh_conv(x, w_ref, b_ref):
        """x: (C, E) f32 -> (Cout, E) f32; 1x5 MeshConv as a single MXU dot."""
        f1 = jnp.dot(x, m_ac, preferred_element_type=f32)
        f2 = jnp.dot(x, m_bd, preferred_element_type=f32)
        f3 = jnp.abs(jnp.dot(x, m_amc, preferred_element_type=f32))
        f4 = jnp.abs(jnp.dot(x, m_bmd, preferred_element_type=f32))
        g = jnp.concatenate([x, f1, f2, f3, f4], axis=0)         # (5C, E)
        w = w_ref[...].astype(f32)                               # (Cout, 5C)
        return jnp.dot(w, g, preferred_element_type=f32) + b_ref[...]

    # --- lane mask: InstanceNorm statistics only over the true edge count ----
    lane_idx = lax.broadcasted_iota(jnp.int32, (1, E), 1)
    mask = jnp.where(lane_idx < e_true, 1.0, 0.0).astype(f32)    # (1, E)
    inv_n = 1.0 / e_true

    def act_norm(y):
        # F.leaky_relu followed by InstanceNorm2d (no affine, biased variance
        # over the edge axis).  Single-pass masked statistics.
        if leaky == 0.0:
            y = jnp.maximum(y, 0.0)
        else:
            y = jnp.where(y >= 0, y, leaky * y)
        ym = y * mask
        mean = jnp.sum(ym, axis=1, keepdims=True) * inv_n
        ex2 = jnp.sum(ym * ym, axis=1, keepdims=True) * inv_n
        var = jnp.maximum(ex2 - mean * mean, 0.0)
        return (y - mean) * lax.rsqrt(var + EPS)

    # --- up_conv: MeshConv only (matches torch .squeeze(3)) ------------------
    x1 = mesh_conv(from_up_ref[...].astype(f32), up_w_ref, up_b_ref)

    # --- conv1 on cat([x1, from_down], channel axis) + leaky_relu + bn[0] ----
    xcat = jnp.concatenate([x1, from_down_ref[...].astype(f32)], axis=0)
    x1 = act_norm(mesh_conv(xcat, c1_w_ref, c1_b_ref))

    # --- conv2 blocks: conv + leaky_relu + bn[i+1] (+ residual) --------------
    x2 = x1
    for i in range(n_blocks):
        w_ref, b_ref = c2_refs[2 * i], c2_refs[2 * i + 1]
        x2 = act_norm(mesh_conv(x1, w_ref, b_ref))
        if residual:
            x2 = x2 + x1
        x1 = x2

    out_ref[...] = (x2 * mask).astype(out_ref.dtype)


# ------------------------------ wrapper --------------------------------------

def _vmem_limit_bytes():
    # Per-generation budget (review): ~3/4 of physical VMEM, capped at 100 MiB
    # (v5e/v6e 128 MiB -> 96 MiB, v7x 64 MiB -> 48 MiB).
    try:
        cap = pltpu.get_tpu_info().vmem_capacity_bytes
    except Exception:                      # query unavailable -> conservative
        cap = 64 * 1024 * 1024
    return int(min(cap * 3 // 4, 100 * 1024 * 1024))


def _stack_weight(w, cin_pad):
    """torch Conv2d weight (Cout, Cin, 1, 5) -> (Cout, 5*cin_pad) bf16, laid out
    so that W_stacked @ concat([f0..f4], axis=0) reproduces the 1x5 conv."""
    cout, cin = w.shape[0], w.shape[1]
    w = w[:, :, 0, :]                                       # (Cout, Cin, 5)
    if cin_pad != cin:
        w = jnp.pad(w, ((0, 0), (0, cin_pad - cin), (0, 0)))
    return jnp.transpose(w, (0, 2, 1)).reshape(cout, 5 * cin_pad).astype(jnp.bfloat16)


@functools.partial(jax.jit, static_argnames=("leaky", "residual", "blocks"))
def upconv_forward(params, from_up, from_down, gemm, *, leaky=0.0,
                   residual=True, blocks=1):
    """from_up: (B, Cin, E); from_down: (B, Cout, E); gemm: (B, E, 4) int32
    (-1 = missing neighbor).  Returns (B, Cout, E) — torch output x2.squeeze(3)."""
    B, Cin, E = from_up.shape
    Cout = params["up_w"].shape[0]
    assert Cout % SUBLANE == 0, "TODO(synk): pad out_channels to a multiple of 8"

    E_pad = _round_up(max(E, LANE), LANE)       # lane-dense edge axis
    Cin_pad = _round_up(Cin, SUBLANE)           # sublane-aligned feature stacks

    # bf16 transport of activations; zero-pad channels / edges.
    fu = jnp.pad(from_up,
                 ((0, 0), (0, Cin_pad - Cin), (0, E_pad - E))).astype(jnp.bfloat16)
    fd = jnp.pad(from_down, ((0, 0), (0, 0), (0, E_pad - E))).astype(jnp.bfloat16)
    # gemm -> channel-first (B, 4, E_pad); padded edges marked "missing" (-1).
    g = jnp.transpose(gemm.astype(jnp.int32), (0, 2, 1))
    g = jnp.pad(g, ((0, 0), (0, 0), (0, E_pad - E)), constant_values=-1)

    inputs = [
        fu, fd, g,
        _stack_weight(params["up_w"], Cin_pad),
        params["up_b"].reshape(-1, 1).astype(jnp.float32),
        _stack_weight(params["c1_w"], 2 * Cout),
        params["c1_b"].reshape(-1, 1).astype(jnp.float32),
    ]
    for i in range(blocks):
        inputs.append(_stack_weight(params["c2_w"][i], Cout))
        inputs.append(params["c2_b"][i].reshape(-1, 1).astype(jnp.float32))

    in_specs = [
        pl.BlockSpec((None, Cin_pad, E_pad), lambda b: (b, 0, 0)),
        pl.BlockSpec((None, Cout, E_pad), lambda b: (b, 0, 0)),
        pl.BlockSpec((None, 4, E_pad), lambda b: (b, 0, 0)),
    ]
    # Weights / biases: whole-array blocks, constant index_map -> VMEM-resident.
    for a in inputs[3:]:
        in_specs.append(pl.BlockSpec(a.shape, lambda b: (0, 0)))

    kernel = functools.partial(_upconv_megafused_kernel, n_blocks=blocks,
                               leaky=leaky, residual=residual, e_true=E)

    out = pl.pallas_call(
        kernel,
        out_shape=jax.ShapeDtypeStruct((B, Cout, E_pad), jnp.float32),
        grid=(B,),
        in_specs=in_specs,
        out_specs=pl.BlockSpec((None, Cout, E_pad), lambda b: (b, 0, 0)),
        compiler_params=pltpu.CompilerParams(
            dimension_semantics=("parallel",),          # megacore over batch
            vmem_limit_bytes=_vmem_limit_bytes()),
    )(*inputs)
    return out[:, :, :E]


# ------------------------------ params / main --------------------------------

def init_params(key, in_ch, out_ch, blocks):
    keys = jax.random.split(key, 4 + 2 * blocks)

    def conv_w(k, cin, cout):
        return 0.1 * jax.random.normal(k, (cout, cin, 1, 5), jnp.float32)

    def conv_b(k, cout):
        return 0.1 * jax.random.normal(k, (cout,), jnp.float32)

    return {
        "up_w": conv_w(keys[0], in_ch, out_ch),
        "up_b": conv_b(keys[1], out_ch),
        "c1_w": conv_w(keys[2], 2 * out_ch, out_ch),
        "c1_b": conv_b(keys[3], out_ch),
        "c2_w": [conv_w(keys[4 + 2 * i], out_ch, out_ch) for i in range(blocks)],
        "c2_b": [conv_b(keys[5 + 2 * i], out_ch) for i in range(blocks)],
    }


if __name__ == "__main__":
    B, E = 2, 16
    in_ch, out_ch, blocks = 4, 8, 1

    key = jax.random.PRNGKey(0)
    k1, k2, k3, k4 = jax.random.split(key, 4)
    from_up = jax.random.normal(k1, (B, in_ch, E), jnp.float32)
    from_down = jax.random.normal(k2, (B, out_ch, E), jnp.float32)
    gemm = jax.random.randint(k3, (B, E, 4), -1, E).astype(jnp.int32)
    params = init_params(k4, in_ch, out_ch, blocks)

    out = upconv_forward(params, from_up, from_down, gemm,
                         leaky=0.0, residual=True, blocks=blocks)
    jax.block_until_ready(out)
    assert out.shape == (B, out_ch, E), out.shape
    assert bool(jnp.all(jnp.isfinite(out)))
    print("KERNEL_OK")
</pallas_src>

<mosaic_0001>
module attributes {stable_mosaic.version = 11 : i64} {
  func.func @_upconv_megafused_kernel(%arg0: i32, %arg1: memref<1x8x128xbf16, #tpu.memory_space<vmem>>, %arg2: memref<1x8x128xbf16, #tpu.memory_space<vmem>>, %arg3: memref<1x4x128xi32, #tpu.memory_space<vmem>>, %arg4: memref<8x40xbf16, #tpu.memory_space<vmem>>, %arg5: memref<8x1xf32, #tpu.memory_space<vmem>>, %arg6: memref<8x80xbf16, #tpu.memory_space<vmem>>, %arg7: memref<8x1xf32, #tpu.memory_space<vmem>>, %arg8: memref<8x40xbf16, #tpu.memory_space<vmem>>, %arg9: memref<8x1xf32, #tpu.memory_space<vmem>>, %arg10: memref<1x8x128xf32, #tpu.memory_space<vmem>>) attributes {dimension_semantics = [#tpu.dimension_semantics<parallel>], iteration_bounds = array<i64: 2>, scalar_prefetch = 0 : i64, scratch_operands = 0 : i64, tpu.core_type = #tpu.core_type<tc>, window_params = [{transform_indices = @transform_0, window_bounds = array<i64: 1, 8, 128>}, {transform_indices = @transform_1, window_bounds = array<i64: 1, 8, 128>}, {transform_indices = @transform_2, window_bounds = array<i64: 1, 4, 128>}, {pipeline_mode = #tpu.pipeline_mode<synchronous>, transform_indices = @transform_3, window_bounds = array<i64: 8, 40>}, {pipeline_mode = #tpu.pipeline_mode<synchronous>, transform_indices = @transform_4, window_bounds = array<i64: 8, 1>}, {pipeline_mode = #tpu.pipeline_mode<synchronous>, transform_indices = @transform_5, window_bounds = array<i64: 8, 80>}, {pipeline_mode = #tpu.pipeline_mode<synchronous>, transform_indices = @transform_6, window_bounds = array<i64: 8, 1>}, {pipeline_mode = #tpu.pipeline_mode<synchronous>, transform_indices = @transform_7, window_bounds = array<i64: 8, 40>}, {pipeline_mode = #tpu.pipeline_mode<synchronous>, transform_indices = @transform_8, window_bounds = array<i64: 8, 1>}, {transform_indices = @transform_9, window_bounds = array<i64: 1, 8, 128>}]} {
    %c0 = arith.constant 0 : index
    %c0_0 = arith.constant 0 : index
    %c0_1 = arith.constant 0 : index
    %0 = vector.load %arg3[%c0, %c0_0, %c0_1] : memref<1x4x128xi32, #tpu.memory_space<vmem>>, vector<1x4x128xi32>
    %1 = vector.shape_cast %0 : vector<1x4x128xi32> to vector<4x128xi32>
    %2 = tpu.iota {dimensions = array<i32: 0>} : vector<128x128xi32>
    %3 = vector.extract_strided_slice %1 {offsets = [0, 0], sizes = [1, 128], strides = [1, 1]} : vector<4x128xi32> to vector<1x128xi32>
    %4 = vector.broadcast %3 : vector<1x128xi32> to vector<128x128xi32>
    %5 = arith.cmpi eq, %2, %4 : vector<128x128xi32>
    %cst = arith.constant 1.000000e+00 : f32
    %cst_2 = arith.constant 0.000000e+00 : f32
    %6 = vector.broadcast %cst : f32 to vector<128x128xf32>
    %7 = vector.broadcast %cst_2 : f32 to vector<128x128xf32>
    %8 = arith.select %5, %6, %7 : vector<128x128xi1>, vector<128x128xf32>
    %9 = vector.extract_strided_slice %1 {offsets = [1, 0], sizes = [1, 128], strides = [1, 1]} : vector<4x128xi32> to vector<1x128xi32>
    %10 = vector.broadcast %9 : vector<1x128xi32> to vector<128x128xi32>
    %11 = arith.cmpi eq, %2, %10 : vector<128x128xi32>
    %cst_3 = arith.constant 1.000000e+00 : f32
    %cst_4 = arith.constant 0.000000e+00 : f32
    %12 = vector.broadcast %cst_3 : f32 to vector<128x128xf32>
    %13 = vector.broadcast %cst_4 : f32 to vector<128x128xf32>
    %14 = arith.select %11, %12, %13 : vector<128x128xi1>, vector<128x128xf32>
    %15 = vector.extract_strided_slice %1 {offsets = [2, 0], sizes = [1, 128], strides = [1, 1]} : vector<4x128xi32> to vector<1x128xi32>
    %16 = vector.broadcast %15 : vector<1x128xi32> to vector<128x128xi32>
    %17 = arith.cmpi eq, %2, %16 : vector<128x128xi32>
    %cst_5 = arith.constant 1.000000e+00 : f32
    %cst_6 = arith.constant 0.000000e+00 : f32
    %18 = vector.broadcast %cst_5 : f32 to vector<128x128xf32>
    %19 = vector.broadcast %cst_6 : f32 to vector<128x128xf32>
    %20 = arith.select %17, %18, %19 : vector<128x128xi1>, vector<128x128xf32>
    %21 = vector.extract_strided_slice %1 {offsets = [3, 0], sizes = [1, 128], strides = [1, 1]} : vector<4x128xi32> to vector<1x128xi32>
    %22 = vector.broadcast %21 : vector<1x128xi32> to vector<128x128xi32>
    %23 = arith.cmpi eq, %2, %22 : vector<128x128xi32>
    %cst_7 = arith.constant 1.000000e+00 : f32
    %cst_8 = arith.constant 0.000000e+00 : f32
    %24 = vector.broadcast %cst_7 : f32 to vector<128x128xf32>
    %25 = vector.broadcast %cst_8 : f32 to vector<128x128xf32>
    %26 = arith.select %23, %24, %25 : vector<128x128xi1>, vector<128x128xf32>
    %27 = arith.addf %8, %20 : vector<128x128xf32>
    %28 = arith.addf %14, %26 : vector<128x128xf32>
    %29 = arith.subf %8, %20 : vector<128x128xf32>
    %30 = arith.subf %14, %26 : vector<128x128xf32>
    %31 = tpu.iota {dimensions = array<i32: 1>} : vector<1x128xi32>
    %c16_i32 = arith.constant 16 : i32
    %32 = vector.broadcast %c16_i32 : i32 to vector<1x128xi32>
    %33 = arith.cmpi slt, %31, %32 : vector<1x128xi32>
    %cst_9 = arith.constant 1.000000e+00 : f32
    %cst_10 = arith.constant 0.000000e+00 : f32
    %34 = vector.broadcast %cst_9 : f32 to vector<1x128xf32>
    %35 = vector.broadcast %cst_10 : f32 to vector<1x128xf32>
    %36 = arith.select %33, %34, %35 : vector<1x128xi1>, vector<1x128xf32>
    %c0_11 = arith.constant 0 : index
    %c0_12 = arith.constant 0 : index
    %c0_13 = arith.constant 0 : index
    %37 = vector.load %arg1[%c0_11, %c0_12, %c0_13] : memref<1x8x128xbf16, #tpu.memory_space<vmem>>, vector<1x8x128xbf16>
    %38 = vector.shape_cast %37 : vector<1x8x128xbf16> to vector<8x128xbf16>
    %39 = arith.extf %38 : vector<8x128xbf16> to vector<8x128xf32>
    %cst_14 = arith.constant dense<0.000000e+00> : vector<8x128xf32>
    %40 = tpu.matmul %39, %27, %cst_14 {dimension_numbers = #tpu.dot_dimension_numbers<[1], [0], [0], [1], [0, 0, 1, 1], [], []>} : vector<8x128xf32>, vector<128x128xf32>, vector<8x128xf32> -> vector<8x128xf32>
    %cst_15 = arith.constant dense<0.000000e+00> : vector<8x128xf32>
    %41 = tpu.matmul %39, %28, %cst_15 {dimension_numbers = #tpu.dot_dimension_numbers<[1], [0], [0], [1], [0, 0, 1, 1], [], []>} : vector<8x128xf32>, vector<128x128xf32>, vector<8x128xf32> -> vector<8x128xf32>
    %cst_16 = arith.constant dense<0.000000e+00> : vector<8x128xf32>
    %42 = tpu.matmul %39, %29, %cst_16 {dimension_numbers = #tpu.dot_dimension_numbers<[1], [0], [0], [1], [0, 0, 1, 1], [], []>} : vector<8x128xf32>, vector<128x128xf32>, vector<8x128xf32> -> vector<8x128xf32>
    %43 = math.absf %42 : vector<8x128xf32>
    %cst_17 = arith.constant dense<0.000000e+00> : vector<8x128xf32>
    %44 = tpu.matmul %39, %30, %cst_17 {dimension_numbers = #tpu.dot_dimension_numbers<[1], [0], [0], [1], [0, 0, 1, 1], [], []>} : vector<8x128xf32>, vector<128x128xf32>, vector<8x128xf32> -> vector<8x128xf32>
    %45 = math.absf %44 : vector<8x128xf32>
    %46 = tpu.concatenate %39, %40, %41, %43, %45 in 0 : vector<8x128xf32>, vector<8x128xf32>, vector<8x128xf32>, vector<8x128xf32>, vector<8x128xf32> -> vector<40x128xf32>
    %c0_18 = arith.constant 0 : index
    %c0_19 = arith.constant 0 : index
    %47 = vector.load %arg4[%c0_18, %c0_19] : memref<8x40xbf16, #tpu.memory_space<vmem>>, vector<8x40xbf16>
    %48 = arith.extf %47 : vector<8x40xbf16> to vector<8x40xf32>
    %cst_20 = arith.constant dense<0.000000e+00> : vector<8x128xf32>
    %49 = tpu.matmul %48, %46, %cst_20 {dimension_numbers = #tpu.dot_dimension_numbers<[1], [0], [0], [1], [0, 0, 1, 1], [], []>} : vector<8x40xf32>, vector<40x128xf32>, vector<8x128xf32> -> vector<8x128xf32>
    %c0_21 = arith.constant 0 : index
    %c0_22 = arith.constant 0 : index
    %50 = vector.load %arg5[%c0_21, %c0_22] : memref<8x1xf32, #tpu.memory_space<vmem>>, vector<8x1xf32>
    %51 = vector.broadcast %50 : vector<8x1xf32> to vector<8x128xf32>
    %52 = arith.addf %49, %51 : vector<8x128xf32>
    %c0_23 = arith.constant 0 : index
    %c0_24 = arith.constant 0 : index
    %c0_25 = arith.constant 0 : index
    %53 = vector.load %arg2[%c0_23, %c0_24, %c0_25] : memref<1x8x128xbf16, #tpu.memory_space<vmem>>, vector<1x8x128xbf16>
    %54 = vector.shape_cast %53 : vector<1x8x128xbf16> to vector<8x128xbf16>
    %55 = arith.extf %54 : vector<8x128xbf16> to vector<8x128xf32>
    %56 = tpu.concatenate %52, %55 in 0 : vector<8x128xf32>, vector<8x128xf32> -> vector<16x128xf32>
    %cst_26 = arith.constant dense<0.000000e+00> : vector<16x128xf32>
    %57 = tpu.matmul %56, %27, %cst_26 {dimension_numbers = #tpu.dot_dimension_numbers<[1], [0], [0], [1], [0, 0, 1, 1], [], []>} : vector<16x128xf32>, vector<128x128xf32>, vector<16x128xf32> -> vector<16x128xf32>
    %cst_27 = arith.constant dense<0.000000e+00> : vector<16x128xf32>
    %58 = tpu.matmul %56, %28, %cst_27 {dimension_numbers = #tpu.dot_dimension_numbers<[1], [0], [0], [1], [0, 0, 1, 1], [], []>} : vector<16x128xf32>, vector<128x128xf32>, vector<16x128xf32> -> vector<16x128xf32>
    %cst_28 = arith.constant dense<0.000000e+00> : vector<16x128xf32>
    %59 = tpu.matmul %56, %29, %cst_28 {dimension_numbers = #tpu.dot_dimension_numbers<[1], [0], [0], [1], [0, 0, 1, 1], [], []>} : vector<16x128xf32>, vector<128x128xf32>, vector<16x128xf32> -> vector<16x128xf32>
    %60 = math.absf %59 : vector<16x128xf32>
    %cst_29 = arith.constant dense<0.000000e+00> : vector<16x128xf32>
    %61 = tpu.matmul %56, %30, %cst_29 {dimension_numbers = #tpu.dot_dimension_numbers<[1], [0], [0], [1], [0, 0, 1, 1], [], []>} : vector<16x128xf32>, vector<128x128xf32>, vector<16x128xf32> -> vector<16x128xf32>
    %62 = math.absf %61 : vector<16x128xf32>
    %63 = tpu.concatenate %56, %57, %58, %60, %62 in 0 : vector<16x128xf32>, vector<16x128xf32>, vector<16x128xf32>, vector<16x128xf32>, vector<16x128xf32> -> vector<80x128xf32>
    %c0_30 = arith.constant 0 : index
    %c0_31 = arith.constant 0 : index
    %64 = vector.load %arg6[%c0_30, %c0_31] : memref<8x80xbf16, #tpu.memory_space<vmem>>, vector<8x80xbf16>
    %65 = arith.extf %64 : vector<8x80xbf16> to vector<8x80xf32>
    %cst_32 = arith.constant dense<0.000000e+00> : vector<8x128xf32>
    %66 = tpu.matmul %65, %63, %cst_32 {dimension_numbers = #tpu.dot_dimension_numbers<[1], [0], [0], [1], [0, 0, 1, 1], [], []>} : vector<8x80xf32>, vector<80x128xf32>, vector<8x128xf32> -> vector<8x128xf32>
    %c0_33 = arith.constant 0 : index
    %c0_34 = arith.constant 0 : index
    %67 = vector.load %arg7[%c0_33, %c0_34] : memref<8x1xf32, #tpu.memory_space<vmem>>, vector<8x1xf32>
    %68 = vector.broadcast %67 : vector<8x1xf32> to vector<8x128xf32>
    %69 = arith.addf %66, %68 : vector<8x128xf32>
    %cst_35 = arith.constant 0.000000e+00 : f32
    %70 = vector.broadcast %cst_35 : f32 to vector<8x128xf32>
    %71 = arith.maximumf %69, %70 : vector<8x128xf32>
    %72 = vector.broadcast %36 : vector<1x128xf32> to vector<8x128xf32>
    %73 = arith.mulf %71, %72 : vector<8x128xf32>
    %cst_36 = arith.constant dense<0.000000e+00> : vector<8xf32>
    %74 = vector.multi_reduction <add>, %73, %cst_36 [1] : vector<8x128xf32> to vector<8xf32>
    %75 = vector.shape_cast %74 : vector<8xf32> to vector<8x1xf32>
    %cst_37 = arith.constant 6.250000e-02 : f32
    %76 = vector.broadcast %cst_37 : f32 to vector<8x1xf32>
    %77 = arith.mulf %75, %76 : vector<8x1xf32>
    %78 = arith.mulf %73, %73 : vector<8x128xf32>
    %cst_38 = arith.constant dense<0.000000e+00> : vector<8xf32>
    %79 = vector.multi_reduction <add>, %78, %cst_38 [1] : vector<8x128xf32> to vector<8xf32>
    %80 = vector.shape_cast %79 : vector<8xf32> to vector<8x1xf32>
    %cst_39 = arith.constant 6.250000e-02 : f32
    %81 = vector.broadcast %cst_39 : f32 to vector<8x1xf32>
    %82 = arith.mulf %80, %81 : vector<8x1xf32>
    %83 = arith.mulf %77, %77 : vector<8x1xf32>
    %84 = arith.subf %82, %83 : vector<8x1xf32>
    %cst_40 = arith.constant 0.000000e+00 : f32
    %85 = vector.broadcast %cst_40 : f32 to vector<8x1xf32>
    %86 = arith.maximumf %84, %85 : vector<8x1xf32>
    %87 = vector.broadcast %77 : vector<8x1xf32> to vector<8x128xf32>
    %88 = arith.subf %71, %87 : vector<8x128xf32>
    %cst_41 = arith.constant 9.99999974E-6 : f32
    %89 = vector.broadcast %cst_41 : f32 to vector<8x1xf32>
    %90 = arith.addf %86, %89 : vector<8x1xf32>
    %91 = math.rsqrt %90 : vector<8x1xf32>
    %92 = vector.broadcast %91 : vector<8x1xf32> to vector<8x128xf32>
    %93 = arith.mulf %88, %92 : vector<8x128xf32>
    %cst_42 = arith.constant dense<0.000000e+00> : vector<8x128xf32>
    %94 = tpu.matmul %93, %27, %cst_42 {dimension_numbers = #tpu.dot_dimension_numbers<[1], [0], [0], [1], [0, 0, 1, 1], [], []>} : vector<8x128xf32>, vector<128x128xf32>, vector<8x128xf32> -> vector<8x128xf32>
    %cst_43 = arith.constant dense<0.000000e+00> : vector<8x128xf32>
    %95 = tpu.matmul %93, %28, %cst_43 {dimension_numbers = #tpu.dot_dimension_numbers<[1], [0], [0], [1], [0, 0, 1, 1], [], []>} : vector<8x128xf32>, vector<128x128xf32>, vector<8x128xf32> -> vector<8x128xf32>
    %cst_44 = arith.constant dense<0.000000e+00> : vector<8x128xf32>
    %96 = tpu.matmul %93, %29, %cst_44 {dimension_numbers = #tpu.dot_dimension_numbers<[1], [0], [0], [1], [0, 0, 1, 1], [], []>} : vector<8x128xf32>, vector<128x128xf32>, vector<8x128xf32> -> vector<8x128xf32>
    %97 = math.absf %96 : vector<8x128xf32>
    %cst_45 = arith.constant dense<0.000000e+00> : vector<8x128xf32>
    %98 = tpu.matmul %93, %30, %cst_45 {dimension_numbers = #tpu.dot_dimension_numbers<[1], [0], [0], [1], [0, 0, 1, 1], [], []>} : vector<8x128xf32>, vector<128x128xf32>, vector<8x128xf32> -> vector<8x128xf32>
    %99 = math.absf %98 : vector<8x128xf32>
    %100 = tpu.concatenate %93, %94, %95, %97, %99 in 0 : vector<8x128xf32>, vector<8x128xf32>, vector<8x128xf32>, vector<8x128xf32>, vector<8x128xf32> -> vector<40x128xf32>
    %c0_46 = arith.constant 0 : index
    %c0_47 = arith.constant 0 : index
    %101 = vector.load %arg8[%c0_46, %c0_47] : memref<8x40xbf16, #tpu.memory_space<vmem>>, vector<8x40xbf16>
    %102 = arith.extf %101 : vector<8x40xbf16> to vector<8x40xf32>
    %cst_48 = arith.constant dense<0.000000e+00> : vector<8x128xf32>
    %103 = tpu.matmul %102, %100, %cst_48 {dimension_numbers = #tpu.dot_dimension_numbers<[1], [0], [0], [1], [0, 0, 1, 1], [], []>} : vector<8x40xf32>, vector<40x128xf32>, vector<8x128xf32> -> vector<8x128xf32>
    %c0_49 = arith.constant 0 : index
    %c0_50 = arith.constant 0 : index
    %104 = vector.load %arg9[%c0_49, %c0_50] : memref<8x1xf32, #tpu.memory_space<vmem>>, vector<8x1xf32>
    %105 = vector.broadcast %104 : vector<8x1xf32> to vector<8x128xf32>
    %106 = arith.addf %103, %105 : vector<8x128xf32>
    %cst_51 = arith.constant 0.000000e+00 : f32
    %107 = vector.broadcast %cst_51 : f32 to vector<8x128xf32>
    %108 = arith.maximumf %106, %107 : vector<8x128xf32>
    %109 = vector.broadcast %36 : vector<1x128xf32> to vector<8x128xf32>
    %110 = arith.mulf %108, %109 : vector<8x128xf32>
    %cst_52 = arith.constant dense<0.000000e+00> : vector<8xf32>
    %111 = vector.multi_reduction <add>, %110, %cst_52 [1] : vector<8x128xf32> to vector<8xf32>
    %112 = vector.shape_cast %111 : vector<8xf32> to vector<8x1xf32>
    %cst_53 = arith.constant 6.250000e-02 : f32
    %113 = vector.broadcast %cst_53 : f32 to vector<8x1xf32>
    %114 = arith.mulf %112, %113 : vector<8x1xf32>
    %115 = arith.mulf %110, %110 : vector<8x128xf32>
    %cst_54 = arith.constant dense<0.000000e+00> : vector<8xf32>
    %116 = vector.multi_reduction <add>, %115, %cst_54 [1] : vector<8x128xf32> to vector<8xf32>
    %117 = vector.shape_cast %116 : vector<8xf32> to vector<8x1xf32>
    %cst_55 = arith.constant 6.250000e-02 : f32
    %118 = vector.broadcast %cst_55 : f32 to vector<8x1xf32>
    %119 = arith.mulf %117, %118 : vector<8x1xf32>
    %120 = arith.mulf %114, %114 : vector<8x1xf32>
    %121 = arith.subf %119, %120 : vector<8x1xf32>
    %cst_56 = arith.constant 0.000000e+00 : f32
    %122 = vector.broadcast %cst_56 : f32 to vector<8x1xf32>
    %123 = arith.maximumf %121, %122 : vector<8x1xf32>
    %124 = vector.broadcast %114 : vector<8x1xf32> to vector<8x128xf32>
    %125 = arith.subf %108, %124 : vector<8x128xf32>
    %cst_57 = arith.constant 9.99999974E-6 : f32
    %126 = vector.broadcast %cst_57 : f32 to vector<8x1xf32>
    %127 = arith.addf %123, %126 : vector<8x1xf32>
    %128 = math.rsqrt %127 : vector<8x1xf32>
    %129 = vector.broadcast %128 : vector<8x1xf32> to vector<8x128xf32>
    %130 = arith.mulf %125, %129 : vector<8x128xf32>
    %131 = arith.addf %130, %93 : vector<8x128xf32>
    %132 = vector.broadcast %36 : vector<1x128xf32> to vector<8x128xf32>
    %133 = arith.mulf %131, %132 : vector<8x128xf32>
    %c0_58 = arith.constant 0 : index
    %c0_59 = arith.constant 0 : index
    %c0_60 = arith.constant 0 : index
    %134 = vector.load %arg10[%c0_58, %c0_59, %c0_60] : memref<1x8x128xf32, #tpu.memory_space<vmem>>, vector<1x8x128xf32>
    %135 = vector.shape_cast %134 : vector<1x8x128xf32> to vector<8x128xf32>
    %136 = vector.shape_cast %133 : vector<8x128xf32> to vector<1x8x128xf32>
    tpu.vector_store %arg10[%c0_58, %c0_59, %c0_60], %136 {strides = array<i32>} : memref<1x8x128xf32, #tpu.memory_space<vmem>>, vector<1x8x128xf32>,
    return
  }
  func.func @transform_0(%arg0: i32) -> (i32, i32, i32) {
    %c0_i32 = arith.constant 0 : i32
    %c0_i32_0 = arith.constant 0 : i32
    %c0_i32_1 = arith.constant 0 : i32
    return %arg0, %c0_i32, %c0_i32_0 : i32, i32, i32
  }
  func.func @transform_1(%arg0: i32) -> (i32, i32, i32) {
    %c0_i32 = arith.constant 0 : i32
    %c0_i32_0 = arith.constant 0 : i32
    %c0_i32_1 = arith.constant 0 : i32
    return %arg0, %c0_i32, %c0_i32_0 : i32, i32, i32
  }
  func.func @transform_2(%arg0: i32) -> (i32, i32, i32) {
    %c0_i32 = arith.constant 0 : i32
    %c0_i32_0 = arith.constant 0 : i32
    %c0_i32_1 = arith.constant 0 : i32
    return %arg0, %c0_i32, %c0_i32_0 : i32, i32, i32
  }
  func.func @transform_3(%arg0: i32) -> (i32, i32) {
    %c0_i32 = arith.constant 0 : i32
    %c0_i32_0 = arith.constant 0 : i32
    %c0_i32_1 = arith.constant 0 : i32
    return %c0_i32, %c0_i32_0 : i32, i32
  }
  func.func @transform_4(%arg0: i32) -> (i32, i32) {
    %c0_i32 = arith.constant 0 : i32
    %c0_i32_0 = arith.constant 0 : i32
    %c0_i32_1 = arith.constant 0 : i32
    return %c0_i32, %c0_i32_0 : i32, i32
  }
  func.func @transform_5(%arg0: i32) -> (i32, i32) {
    %c0_i32 = arith.constant 0 : i32
    %c0_i32_0 = arith.constant 0 : i32
    %c0_i32_1 = arith.constant 0 : i32
    return %c0_i32, %c0_i32_0 : i32, i32
  }
  func.func @transform_6(%arg0: i32) -> (i32, i32) {
    %c0_i32 = arith.constant 0 : i32
    %c0_i32_0 = arith.constant 0 : i32
    %c0_i32_1 = arith.constant 0 : i32
    return %c0_i32, %c0_i32_0 : i32, i32
  }
  func.func @transform_7(%arg0: i32) -> (i32, i32) {
    %c0_i32 = arith.constant 0 : i32
    %c0_i32_0 = arith.constant 0 : i32
    %c0_i32_1 = arith.constant 0 : i32
    return %c0_i32, %c0_i32_0 : i32, i32
  }
  func.func @transform_8(%arg0: i32) -> (i32, i32) {
    %c0_i32 = arith.constant 0 : i32
    %c0_i32_0 = arith.constant 0 : i32
    %c0_i32_1 = arith.constant 0 : i32
    return %c0_i32, %c0_i32_0 : i32, i32
  }
  func.func @transform_9(%arg0: i32) -> (i32, i32, i32) {
    %c0_i32 = arith.constant 0 : i32
    %c0_i32_0 = arith.constant 0 : i32
    %c0_i32_1 = arith.constant 0 : i32
    return %arg0, %c0_i32, %c0_i32_0 : i32, i32, i32
  }
}

</mosaic_0001>

<bundles_post_ra>
// kernel: upconv_forward.1
= control target key start
LH: loop header
LB: loop body
LE: loop exit
PB: predicated region body
PF: predicated region fallthrough
CT: control target
= control target key end

     0   :  { %14 = vsyncpa [#allocation3], 0  ;;  %s4005_s0 = inlined_call_operand.vmem [shape: bf16[2,8,128], index: 0, kind: input, shape index: {}]   ;;  %s4006_s1 = inlined_call_operand.vmem [shape: bf16[2,8,128], index: 1, kind: input, shape index: {}]   ;;  %s4007_s2 = inlined_call_operand.vmem [shape: s32[2,4,128], index: 2, kind: input, shape index: {}]   ;;  %s4008_s3 = inlined_call_operand.vmem [shape: bf16[8,40], index: 3, kind: input, shape index: {}]   ;;  %s4009_s4 = inlined_call_operand.vmem [shape: f32[8,1], index: 4, kind: input, shape index: {}]   ;;  %s4010_s5 = inlined_call_operand.vmem [shape: bf16[8,80], index: 5, kind: input, shape index: {}]   ;;  %s4011_s6 = inlined_call_operand.vmem [shape: f32[8,1], index: 6, kind: input, shape index: {}]   ;;  %s4012_s7 = inlined_call_operand.vmem [shape: bf16[8,40], index: 7, kind: input, shape index: {}]   ;;  %s4013_s8 = inlined_call_operand.vmem [shape: f32[8,1], index: 8, kind: input, shape index: {}]   ;;  %s4014_s9 = inlined_call_operand.hbm [shape: f32[2,8,128], index: 9, kind: output, shape index: {}]  }
   0x1   :  { %16 = vsyncpa [#allocation3 + $0x1], 0  ;;  %s3070_s30 = smov 0   ;;  %s3072_s10 = smov 0  }
   0x2   :  { %s3074_s11 = smov 0   ;;  %s3076_s12 = smov 0  }
   0x3 LB: > { %s3091_s13 = sadd.s32 4294967295, %s3013_s12   ;;  %s1841_s14 = sadd.s32 4294967294, %s3013_s12   ;;  %s3013_s12 = sphi %s3076_s12, %s4107_s12   ;;  %s3009_s11 = sphi %s3074_s11, %s4106_s11   ;;  %s3005_s10 = sphi %s3072_s10, %s4105_s10   ;;  %s3001_s30 = sphi %s3070_s30, %s4104_s30  }
   0x4   : > { %s3095_s15 = sadd.s32 1, %s3013_s12   ;;  %s233_s16 = sadd.s32 1, %s3009_s11 }
   0x5   : > { %s230_s17 = ssub.s32 %s3013_s12, %s3095_s15  ;;  %p243_p0 = scmp.ne.s32.totalorder %s3009_s11, %s3005_s10 }
   0x6   : > { %p231_p1 = scmp.eq.s32.totalorder %s230_s17, 0  ;;  %p244_p2 = scmp.eq.s32.totalorder %s3091_s13, 1 }
   0x7   : > { %p249_p3 = scmp.ne.s32.totalorder %s3005_s10, %s3001_s30  ;;  %p250_p4 = scmp.eq.s32.totalorder %s1841_s14, 1 }
   0x8   : > { %s3106_s18 = scalar_select %p231_p1, %s3009_s11, %s233_s16  }
   0x9   : > { %p3108_p5 = por %p244_p2, %p243_p0  ;;  %p3112_p6 = por %p250_p4, %p249_p3 }
   0xa   : > { %p1844_p7 = scmp.ge.s32.totalorder %s3013_s12, 1  ;;  %p307_p8 = scmp.lt.s32.totalorder %s3013_s12, 3 }
   0xc   : > { %p308_p9 = pnand %p1844_p7, %p307_p8 }
   0xe   : > { %311 = sbr.rel (%p308_p9) target bundleno = 1841 (0x731), region = 56 }
  0x15   : > { %p350_p10 = scmp.lt.s32.totalorder %s3091_s13, 1  ;;  %v4015_v0 = vlaneseq  ;;  %v4022_v1 = vmov 0.0|0.0   ;;  %vm3016_vm0 = vmmov 0   ;;  %v3017_v3 = vmov 0.0   ;;  %s347_s17 = sand.u32 1, %s3005_s10  }
  0x16   : > { %2556 = vmatprep.subr.bf16.mxu0 %v4022_v1  ;;  %2580 = vmatprep.subr.bf16.mxu1 %v4022_v1  ;;  %s1853_s23 = sshll.u32 %s3091_s13, 7 }
  0x17   : > { %s351_s21 = scalar_select %p350_p10, %s3091_s13, 1  ;;  %v3123_v2 = vshrl.u32 %v4015_v0, 7  ;;  %2119 = vmatprep.mubr.msk.f32.mxu0 %vm3016_vm0, %v3017_v3  ;;  %2154 = vmatprep.mubr.msk.f32.mxu1 %vm3016_vm0, %v3017_v3 }
  0x18   : > { %s3019_s13 = smov [#allocation2]  }
  0x19   : > { %s3129_s22 = sshll.u32 %s351_s21, 2  ;;  %v365_v4 = vadd.s32 8, %v3123_v2  ;;  %v382_v5 = vsub.s32 0, %v3123_v2  ;;  %v454_v6 = vsub.s32 2, %v3123_v2  ;;  %v3135_v7 = vadd.s32 16, %v3123_v2  ;;  %s1845_s21 = sshll.u32 %s347_s17, 3 }
  0x1a   : > { %s361_s25 = scalar_lea.vmem %s4007_s2, %s3129_s22  ;;  %v3142_v8 = vadd.s32 24, %v3123_v2  ;;  %v418_v9 = vsub.s32 1, %v3123_v2  ;;  %v490_v10 = vsub.s32 3, %v3123_v2  ;;  %v3147_v11 = vadd.s32 32, %v3123_v2  ;;  %s353_s28 = scalar_lea.vmem %s4005_s0, %s3129_s22 }
  0x1b   : > { %v362_v12 = vld [vmem:[%s361_s25] sm:$0xf]  ;;  %v3150_v13 = vadd.s32 40, %v3123_v2  ;;  %v3153_v14 = vadd.s32 48, %v3123_v2  ;;  %v3156_v15 = vadd.s32 56, %v3123_v2  ;;  %v3159_v16 = vadd.s32 64, %v3123_v2 }
  0x1c   : > { %v3161_v17 = vrot.slane %v362_v12, %v382_v5  ;;  %v3163_v18 = vrot.slane %v362_v12, %v454_v6  ;;  %v3165_v19 = vrot.slane %v362_v12, %v418_v9  ;;  %v3167_v20 = vrot.slane %v362_v12, %v490_v10  ;;  %s349_s24 = scalar_lea.vmem [#allocation2], %s1845_s21  ;;  %s2955_s14 = sshll.u32 %s3019_s13, 4  ;;  %s2956_s14 = int_to_ptr.vmem [resolvable:$false] %s2955_s14 }
  0x1d   : > { %v3170_v21 = vadd.s32 72, %v3123_v2  ;;  %v3173_v22 = vadd.s32 80, %v3123_v2  ;;  %v3176_v23 = vadd.s32 88, %v3123_v2  ;;  %v3179_v24 = vadd.s32 96, %v3123_v2  ;;  %s1758_s25 = sshll.u32 %s349_s24, 4  ;;  %s2957_s16 = scalar_lea.vmem %s2956_s14, 256  ;;  %s3965_s25 = int_to_ptr.vmem [resolvable:$true] %s1758_s25 }
  0x1e   : > { %vm384_vm1 = vcmp.eq.s32.totalorder %v3123_v2, %v3161_v17  ;;  %vm385_vm2 = vcmp.eq.s32.totalorder %v365_v4, %v3161_v17  ;;  %vm456_vm3 = vcmp.eq.s32.totalorder %v3123_v2, %v3163_v18  ;;  %vm457_vm4 = vcmp.eq.s32.totalorder %v365_v4, %v3163_v18  ;;  %s2951_s29 = scalar_lea.vmem %s3965_s25, 128  ;;  %p2958_p0 = scmp.lt.s32.totalorder %s3965_s25, %s2956_s14 }
  0x1f   : > { %v3188_v25 = vsel %vm384_vm1, 1.0, %v3017_v3  ;;  %v3191_v26 = vsel %vm385_vm2, 1.0, %v3017_v3  ;;  %v3194_v27 = vsel %vm456_vm3, 1.0, %v3017_v3  ;;  %v3197_v28 = vsel %vm457_vm4, 1.0, %v3017_v3  ;;  %p2952_p11 = scmp.ne.s32.totalorder %s3965_s25, %s2951_s29  ;;  %p2959_p1 = scmp.lt.s32.totalorder %s2957_s16, %s2951_s29 }
  0x20   : > { %v524_v29 = vadd.f32 %v3194_v27, %v3188_v25  ;;  %v525_v30 = vadd.f32 %v3197_v28, %v3191_v26  ;;  %vm386_vm5 = vcmp.eq.s32.totalorder %v3135_v7, %v3161_v17  ;;  %vm387_vm6 = vcmp.eq.s32.totalorder %v3142_v8, %v3161_v17 }
  0x21   : > { %v3208_v31 = vsel %vm386_vm5, 1.0, %v3017_v3  ;;  %v3211_v32 = vsel %vm387_vm6, 1.0, %v3017_v3  ;;  %vm458_vm7 = vcmp.eq.s32.totalorder %v3135_v7, %v3163_v18  ;;  %vm459_vm8 = vcmp.eq.s32.totalorder %v3142_v8, %v3163_v18  ;;  %p2953_p12 = pnand %p2952_p11, %p3108_p5  ;;  %p2960_p2 = por %p2959_p1, %p2958_p0 }
  0x22   : > { %v3217_v33 = vpack.c.bf16 %v525_v30, %v524_v29  ;;  %v3220_v34 = vsel %vm458_vm7, 1.0, %v3017_v3  ;;  %v3223_v35 = vsel %vm459_vm8, 1.0, %v3017_v3  ;;  %vm420_vm9 = vcmp.eq.s32.totalorder %v3123_v2, %v3165_v19 }
  0x23   : > { %v526_v36 = vadd.f32 %v3220_v34, %v3208_v31  ;;  %v527_v37 = vadd.f32 %v3223_v35, %v3211_v32  ;;  %vm421_vm10 = vcmp.eq.s32.totalorder %v365_v4, %v3165_v19  ;;  %v3233_v38 = vsel %vm420_vm9, 1.0, %v3017_v3  ;;  %p2954_p13 = pneg %p2953_p12 }
  0x24   : > { %4056 = vst [vmem:[#allocation5_spill] sm:$0xff] %v3217_v33  ;;  %2558 = vmatpush3.bf16.msra.mxu0 %v3217_v33  ;;  %v3237_v39 = vsel %vm421_vm10, 1.0, %v3017_v3  ;;  %vm492_vm11 = vcmp.eq.s32.totalorder %v3123_v2, %v3167_v20  ;;  %vm493_vm12 = vcmp.eq.s32.totalorder %v365_v4, %v3167_v20  ;;  %vm388_vm13 = vcmp.eq.s32.totalorder %v3147_v11, %v3161_v17 }
  0x25   : > { %2559 = vmatprep.subr.bf16.mxu0 %v4022_v1  ;;  %v3245_v40 = vpack.c.bf16 %v527_v37, %v526_v36  ;;  %v3248_v41 = vsel %vm492_vm11, 1.0, %v3017_v3  ;;  %v3251_v42 = vsel %vm493_vm12, 1.0, %v3017_v3  ;;  %vm389_vm14 = vcmp.eq.s32.totalorder %v3150_v13, %v3161_v17  ;;  %p2961_p3 = pnand %p2960_p2, %p2954_p13 }
  0x26   : > { %v540_v43 = vadd.f32 %v3248_v41, %v3233_v38  ;;  %v541_v44 = vadd.f32 %v3251_v42, %v3237_v39  ;;  %v3260_v45 = vsel %vm388_vm13, 1.0, %v3017_v3  ;;  %v3263_v46 = vsel %vm389_vm14, 1.0, %v3017_v3 }
  0x27   : > { %4057 = vst [vmem:[#allocation6_spill] sm:$0xff] %v3245_v40  ;;  %vm460_vm15 = vcmp.eq.s32.totalorder %v3147_v11, %v3163_v18  ;;  %vm461_vm1 = vcmp.eq.s32.totalorder %v3150_v13, %v3163_v18  ;;  %vm422_vm2 = vcmp.eq.s32.totalorder %v3135_v7, %v3165_v19  ;;  %vm423_vm3 = vcmp.eq.s32.totalorder %v3142_v8, %v3165_v19 }
  0x28   : > { %2561 = vmatpush3.bf16.msra.mxu0 %v3245_v40  ;;  %v3274_v47 = vpack.c.bf16 %v541_v44, %v540_v43  ;;  %v3277_v48 = vsel %vm460_vm15, 1.0, %v3017_v3  ;;  %v3280_v49 = vsel %vm461_vm1, 1.0, %v3017_v3  ;;  %v3283_v50 = vsel %vm422_vm2, 1.0, %v3017_v3 }
  0x29   : > { %2562 = vmatprep.subr.bf16.mxu0 %v4022_v1  ;;  %v528_v51 = vadd.f32 %v3277_v48, %v3260_v45  ;;  %v529_v52 = vadd.f32 %v3280_v49, %v3263_v46  ;;  %v3291_v53 = vsel %vm423_vm3, 1.0, %v3017_v3  ;;  %vm494_vm4 = vcmp.eq.s32.totalorder %v3135_v7, %v3167_v20 }
  0x2a   : > { %4058 = vst [vmem:[#allocation7_spill] sm:$0xff] %v3274_v47  ;;  %2582 = vmatpush3.bf16.msra.mxu1 %v3274_v47  ;;  %vm495_vm5 = vcmp.eq.s32.totalorder %v3142_v8, %v3167_v20  ;;  %v3299_v54 = vsel %vm494_vm4, 1.0, %v3017_v3  ;;  %vm390_vm6 = vcmp.eq.s32.totalorder %v3153_v14, %v3161_v17  ;;  %vm391_vm7 = vcmp.eq.s32.totalorder %v3156_v15, %v3161_v17 }
  0x2b   : > { %v3305_v55 = vpack.c.bf16 %v529_v52, %v528_v51  ;;  %2583 = vmatprep.subr.bf16.mxu1 %v4022_v1  ;;  %v3309_v56 = vsel %vm495_vm5, 1.0, %v3017_v3  ;;  %v542_v57 = vadd.f32 %v3299_v54, %v3283_v50  ;;  %v3314_v58 = vsel %vm390_vm6, 1.0, %v3017_v3 }
  0x2c   : > { %v543_v59 = vadd.f32 %v3309_v56, %v3291_v53  ;;  %v3319_v60 = vsel %vm391_vm7, 1.0, %v3017_v3  ;;  %vm462_vm8 = vcmp.eq.s32.totalorder %v3153_v14, %v3163_v18  ;;  %vm463_vm9 = vcmp.eq.s32.totalorder %v3156_v15, %v3163_v18 }
  0x2d   : > { %4059 = vst [vmem:[#allocation8_spill] sm:$0xff] %v3305_v55  ;;  %2564 = vmatpush3.bf16.msra.mxu0 %v3305_v55  ;;  %v3327_v61 = vsel %vm462_vm8, 1.0, %v3017_v3  ;;  %v3330_v62 = vsel %vm463_vm9, 1.0, %v3017_v3  ;;  %vm424_vm10 = vcmp.eq.s32.totalorder %v3147_v11, %v3165_v19  ;;  %vm425_vm11 = vcmp.eq.s32.totalorder %v3150_v13, %v3165_v19 }
  0x2e   : > { %v3336_v63 = vpack.c.bf16 %v543_v59, %v542_v57  ;;  %2565 = vmatprep.subr.bf16.mxu0 %v4022_v1  ;;  %v530_v4 = vadd.f32 %v3327_v61, %v3314_v58  ;;  %v531_v5 = vadd.f32 %v3330_v62, %v3319_v60  ;;  %v3344_v6 = vsel %vm424_vm10, 1.0, %v3017_v3 }
  0x2f   : > { %v3347_v7 = vsel %vm425_vm11, 1.0, %v3017_v3  ;;  %vm496_vm12 = vcmp.eq.s32.totalorder %v3147_v11, %v3167_v20  ;;  %vm497_vm13 = vcmp.eq.s32.totalorder %v3150_v13, %v3167_v20  ;;  %vm392_vm14 = vcmp.eq.s32.totalorder %v3159_v16, %v3161_v17 }
  0x30   : > { %4060 = vst [vmem:[#allocation9_spill] sm:$0xff] %v3336_v63  ;;  %2585 = vmatpush3.bf16.msra.mxu1 %v3336_v63  ;;  %v3356_v8 = vpack.c.bf16 %v531_v5, %v530_v4  ;;  %v3359_v9 = vsel %vm496_vm12, 1.0, %v3017_v3  ;;  %v3362_v10 = vsel %vm497_vm13, 1.0, %v3017_v3  ;;  %vm393_vm15 = vcmp.eq.s32.totalorder %v3170_v21, %v3161_v17 }
  0x31   : > { %2586 = vmatprep.subr.bf16.mxu1 %v4022_v1  ;;  %v544_v11 = vadd.f32 %v3359_v9, %v3344_v6  ;;  %v545_v12 = vadd.f32 %v3362_v10, %v3347_v7  ;;  %v3372_v13 = vsel %vm392_vm14, 1.0, %v3017_v3  ;;  %v3375_v29 = vsel %vm393_vm15, 1.0, %v3017_v3 }
  0x32   : > { %4061 = vst [vmem:[#allocation10_spill] sm:$0xff] %v3356_v8  ;;  %2567 = vmatpush3.bf16.msra.mxu0 %v3356_v8  ;;  %vm464_vm1 = vcmp.eq.s32.totalorder %v3159_v16, %v3163_v18  ;;  %vm465_vm2 = vcmp.eq.s32.totalorder %v3170_v21, %v3163_v18  ;;  %vm426_vm3 = vcmp.eq.s32.totalorder %v3153_v14, %v3165_v19 }
  0x33   : > { %vm427_vm4 = vcmp.eq.s32.totalorder %v3156_v15, %v3165_v19  ;;  %v3386_v30 = vpack.c.bf16 %v545_v12, %v544_v11  ;;  %2568 = vmatprep.subr.bf16.mxu0 %v4022_v1  ;;  %v3390_v36 = vsel %vm464_vm1, 1.0, %v3017_v3  ;;  %v3393_v37 = vsel %vm465_vm2, 1.0, %v3017_v3 }
  0x34   : > { %v3396_v43 = vsel %vm426_vm3, 1.0, %v3017_v3  ;;  %v532_v44 = vadd.f32 %v3390_v36, %v3372_v13  ;;  %v533_v51 = vadd.f32 %v3393_v37, %v3375_v29  ;;  %v3403_v52 = vsel %vm427_vm4, 1.0, %v3017_v3 }
  0x35   : > { %4062 = vst [vmem:[#allocation11_spill] sm:$0xff] %v3386_v30  ;;  %vm498_vm5 = vcmp.eq.s32.totalorder %v3153_v14, %v3167_v20  ;;  %2588 = vmatpush3.bf16.msra.mxu1 %v3386_v30  ;;  %vm499_vm6 = vcmp.eq.s32.totalorder %v3156_v15, %v3167_v20  ;;  %vm394_vm7 = vcmp.eq.s32.totalorder %v3173_v22, %v3161_v17 }
  0x36   : > { %v3411_v57 = vsel %vm498_vm5, 1.0, %v3017_v3  ;;  %vm395_vm8 = vcmp.eq.s32.totalorder %v3176_v23, %v3161_v17  ;;  %v3417_v59 = vpack.c.bf16 %v533_v51, %v532_v44  ;;  %2589 = vmatprep.subr.bf16.mxu1 %v4022_v1  ;;  %v3421_v14 = vsel %vm499_vm6, 1.0, %v3017_v3 }
  0x37   : > { %v546_v4 = vadd.f32 %v3411_v57, %v3396_v43  ;;  %v3426_v15 = vsel %vm394_vm7, 1.0, %v3017_v3  ;;  %v547_v5 = vadd.f32 %v3421_v14, %v3403_v52  ;;  %v3431_v11 = vsel %vm395_vm8, 1.0, %v3017_v3 }
  0x38   : > { %4063 = vst [vmem:[#allocation12_spill] sm:$0xff] %v3417_v59  ;;  %vm466_vm9 = vcmp.eq.s32.totalorder %v3173_v22, %v3163_v18  ;;  %vm467_vm10 = vcmp.eq.s32.totalorder %v3176_v23, %v3163_v18  ;;  %2570 = vmatpush3.bf16.msra.mxu0 %v3417_v59  ;;  %vm428_vm11 = vcmp.eq.s32.totalorder %v3159_v16, %v3165_v19 }
  0x39   : > { %v3439_v12 = vsel %vm466_vm9, 1.0, %v3017_v3  ;;  %v3442_v44 = vsel %vm467_vm10, 1.0, %v3017_v3  ;;  %vm429_vm12 = vcmp.eq.s32.totalorder %v3170_v21, %v3165_v19  ;;  %v3448_v51 = vpack.c.bf16 %v547_v5, %v546_v4  ;;  %2571 = vmatprep.subr.bf16.mxu0 %v4022_v1 }
  0x3a   : > { %v534_v0 = vadd.f32 %v3439_v12, %v3426_v15  ;;  %v535_v30 = vadd.f32 %v3442_v44, %v3431_v11  ;;  %v3456_v63 = vsel %vm428_vm11, 1.0, %v3017_v3  ;;  %v3459_v47 = vsel %vm429_vm12, 1.0, %v3017_v3 }
  0x3b   : > { %4064 = vst [vmem:[#allocation13_spill] sm:$0xff] %v3448_v51  ;;  %4065 = vst [vmem:[#allocation14_spill] sm:$0xff] %v3459_v47  ;;  %vm500_vm13 = vcmp.eq.s32.totalorder %v3159_v16, %v3167_v20  ;;  %vm501_vm14 = vcmp.eq.s32.totalorder %v3170_v21, %v3167_v20  ;;  %v3466_v4 = vadd.s32 104, %v3123_v2  ;;  %2591 = vmatpush3.bf16.msra.mxu1 %v3448_v51  ;;  %v4067_v16 = vmov 0.0|0.0  }
  0x3c   : > { %v3469_v5 = vpack.c.bf16 %v535_v30, %v534_v0  ;;  %v3472_v1 = vsel %vm500_vm13, 1.0, %v3017_v3  ;;  %v3475_v59 = vsel %vm501_vm14, 1.0, %v3017_v3  ;;  %vm396_vm15 = vcmp.eq.s32.totalorder %v3179_v24, %v3161_v17  ;;  %2592 = vmatprep.subr.bf16.mxu1 %v4067_v16 }
  0x3d   : > { %v548_v21 = vadd.f32 %v3472_v1, %v3456_v63  ;;  %v549_v8 = vadd.f32 %v3475_v59, %v3459_v47  ;;  %vm397_vm1 = vcmp.eq.s32.totalorder %v3466_v4, %v3161_v17  ;;  %v3487_v0 = vsel %vm396_vm15, 1.0, %v3017_v3 }
  0x3e   : > { %4066 = vst [vmem:[#allocation15_spill] sm:$0xff] %v3469_v5  ;;  %4068 = vst [vmem:[#allocation16_spill] sm:$0xff] %v3487_v0  ;;  %2573 = vmatpush3.bf16.msra.mxu0 %v3469_v5  ;;  %v3491_v30 = vsel %vm397_vm1, 1.0, %v3017_v3  ;;  %vm468_vm2 = vcmp.eq.s32.totalorder %v3179_v24, %v3163_v18  ;;  %vm469_vm3 = vcmp.eq.s32.totalorder %v3466_v4, %v3163_v18  ;;  %v378_v47 = vadd.s32 112, %v3123_v2 }
  0x3f   : > { %4069 = vst [vmem:[#allocation17_spill] sm:$0xff] %v3491_v30  ;;  %vm430_vm4 = vcmp.eq.s32.totalorder %v3173_v22, %v3165_v19  ;;  %v3499_v51 = vpack.c.bf16 %v549_v8, %v548_v21  ;;  %2574 = vmatprep.subr.bf16.mxu0 %v4067_v16  ;;  %v3503_v55 = vsel %vm468_vm2, 1.0, %v3017_v3  ;;  %v3506_v5 = vsel %vm469_vm3, 1.0, %v3017_v3 }
  0x40   : > { %vm431_vm5 = vcmp.eq.s32.totalorder %v3176_v23, %v3165_v19  ;;  %v536_v40 = vadd.f32 %v3503_v55, %v3487_v0  ;;  %v537_v33 = vadd.f32 %v3506_v5, %v3491_v30  ;;  %v3515_v8 = vsel %vm430_vm4, 1.0, %v3017_v3 }
  0x41   : > { %4070 = vst [vmem:[#allocation18_spill] sm:$0xff] %v3499_v51  ;;  %4071 = vst [vmem:[#allocation19_spill] sm:$0xff] %v3515_v8  ;;  %v3518_v21 = vsel %vm431_vm5, 1.0, %v3017_v3  ;;  %2594 = vmatpush3.bf16.msra.mxu1 %v3499_v51  ;;  %vm502_vm6 = vcmp.eq.s32.totalorder %v3173_v22, %v3167_v20  ;;  %vm503_vm7 = vcmp.eq.s32.totalorder %v3176_v23, %v3167_v20  ;;  %v379_v0 = vadd.s32 120, %v3123_v2 }
  0x42   : > { %4072 = vst [vmem:[#allocation20_spill] sm:$0xff] %v3518_v21  ;;  %v3531_v30 = vpack.c.bf16 %v537_v33, %v536_v40  ;;  %2595 = vmatprep.subr.bf16.mxu1 %v4067_v16  ;;  %v3535_v51 = vsel %vm502_vm6, 1.0, %v3017_v3  ;;  %v3538_v22 = vsel %vm503_vm7, 1.0, %v3017_v3  ;;  %vm432_vm8 = vcmp.eq.s32.totalorder %v3179_v24, %v3165_v19 }
  0x43   : > { %4074 = vst [vmem:[#allocation22_spill] sm:$0xff] %v3535_v51  ;;  %v550_v2 = vadd.f32 %v3535_v51, %v3515_v8  ;;  %v551_v23 = vadd.f32 %v3538_v22, %v3518_v21  ;;  %vm398_vm9 = vcmp.eq.s32.totalorder %v378_v47, %v3161_v17  ;;  %vm399_vm10 = vcmp.eq.s32.totalorder %v379_v0, %v3161_v17  ;;  %v592_v8 = vld [vmem:[%s353_s28] sm:$0xf]  ;;  %s357_s28 = scalar_lea.vmem %s4006_s1, %s3129_s22  ;;  %s1745_s22 = scalar_lea.sflag [#allocation3], %s347_s17 }
  0x44   : > { %4073 = vst [vmem:[#allocation21_spill] sm:$0xff] %v3531_v30  ;;  %2576 = vmatpush3.bf16.msra.mxu0 %v3531_v30  ;;  %v3550_v33 = vsel %vm398_vm9, 1.0, %v3017_v3  ;;  %v3553_v40 = vsel %vm399_vm10, 1.0, %v3017_v3  ;;  %vm470_vm11 = vcmp.eq.s32.totalorder %v378_v47, %v3163_v18  ;;  %vm471_vm12 = vcmp.eq.s32.totalorder %v379_v0, %v3163_v18 }
  0x45   : > { %4075 = vst [vmem:[#allocation23_spill] sm:$0xff] %v3550_v33  ;;  %4076 = vst [vmem:[#allocation24_spill] sm:$0xff] %v3553_v40  ;;  %v3557_v51 = vpack.c.bf16 %v551_v23, %v550_v2  ;;  %2577 = vmatprep.subr.bf16.mxu0 %v4067_v16  ;;  %v3561_v21 = vsel %vm470_vm11, 1.0, %v3017_v3  ;;  %v3564_v17 = vsel %vm471_vm12, 1.0, %v3017_v3  ;;  %vm433_vm13 = vcmp.eq.s32.totalorder %v3466_v4, %v3165_v19 }
  0x46   : > { %4078 = vst [vmem:[#allocation26_spill] sm:$0xff] %v3561_v21  ;;  %4079 = vst [vmem:[#allocation27_spill] sm:$0xff] %v3564_v17  ;;  %v538_v30 = vadd.f32 %v3561_v21, %v3550_v33  ;;  %v539_v18 = vadd.f32 %v3564_v17, %v3553_v40  ;;  %v3576_v2 = vsel %vm432_vm8, 1.0, %v3017_v3  ;;  %v3579_v23 = vsel %vm433_vm13, 1.0, %v3017_v3 }
  0x47   : > { %4077 = vst [vmem:[#allocation25_spill] sm:$0xff] %v3557_v51  ;;  %2597 = vmatpush3.bf16.msra.mxu1 %v3557_v51  ;;  %vm504_vm14 = vcmp.eq.s32.totalorder %v3179_v24, %v3167_v20  ;;  %vm505_vm15 = vcmp.eq.s32.totalorder %v3466_v4, %v3167_v20  ;;  %v3586_v33 = vunpack.c.l.bf16 %v592_v8  ;;  %v556_v40 = vsub.f32 %v3188_v25, %v3194_v27 }
  0x48   : > { %v3590_v17 = vpack.c.bf16 %v539_v18, %v538_v30  ;;  %2598 = vmatprep.subr.bf16.mxu1 %v4067_v16  ;;  %v3594_v21 = vsel %vm504_vm14, 1.0, %v3017_v3  ;;  %v3597_v51 = vsel %vm505_vm15, 1.0, %v3017_v3  ;;  %v557_v24 = vsub.f32 %v3191_v26, %v3197_v28 }
  0x49   : > { %v552_v4 = vadd.f32 %v3594_v21, %v3576_v2  ;;  %v553_v8 = vadd.f32 %v3597_v51, %v3579_v23  ;;  %vm434_vm1 = vcmp.eq.s32.totalorder %v378_v47, %v3165_v19  ;;  %vm435_vm2 = vcmp.eq.s32.totalorder %v379_v0, %v3165_v19 }
  0x4a   : > { %2579 = vmatpush3.bf16.msra.mxu0 %v3590_v17  ;;  %v3608_v25 = vpack.c.bf16 %v557_v24, %v556_v40  ;;  %v3611_v27 = vsel %vm434_vm1, 1.0, %v3017_v3  ;;  %v3614_v30 = vsel %vm435_vm2, 1.0, %v3017_v3  ;;  %vm506_vm3 = vcmp.eq.s32.totalorder %v378_v47, %v3167_v20 }
  0x4b   : > { %v3617_v26 = vpack.c.bf16 %v553_v8, %v552_v4  ;;  %2604 = vmatprep.subr.bf16.mxu0 %v4067_v16  ;;  %vm507_vm4 = vcmp.eq.s32.totalorder %v379_v0, %v3167_v20  ;;  %v3622_v19 = vsel %vm506_vm3, 1.0, %v3017_v3  ;;  %v558_v28 = vsub.f32 %v3208_v31, %v3220_v34 }
  0x4c   : > { %v3627_v40 = vsel %vm507_vm4, 1.0, %v3017_v3  ;;  %v554_v18 = vadd.f32 %v3622_v19, %v3611_v27  ;;  %v559_v47 = vsub.f32 %v3211_v32, %v3223_v35  ;;  %v572_v0 = vsub.f32 %v3233_v38, %v3248_v41  ;;  %v4089_v8 = vld [vmem:[#allocation24_spill] sm:$0xff] }
  0x4d   : > { %2600 = vmatpush3.bf16.msra.mxu1 %v3617_v26  ;;  %2120 = vmatmul.mubr.f32.vlgmr.msra.gmra.mrb[0].mxu0 %v3586_v33  ;;  %v555_v20 = vadd.f32 %v3627_v40, %v3614_v30  ;;  %v573_v31 = vsub.f32 %v3237_v39, %v3251_v42  ;;  %v560_v32 = vsub.f32 %v3260_v45, %v3277_v48  ;;  %v4088_v4 = vld [vmem:[#allocation27_spill] sm:$0xff]  ;;  %vm884_vm5 = vcmask 326656  }
  0x4e   : > { %2601 = vmatprep.subr.bf16.mxu1 %v4067_v16  ;;  %2606 = vmatpush3.bf16.msra.mxu0 %v3608_v25  ;;  %v3643_v34 = vpack.c.bf16 %v559_v47, %v558_v28  ;;  %v561_v35 = vsub.f32 %v3263_v46, %v3280_v49  ;;  %v574_v39 = vsub.f32 %v3283_v50, %v3299_v54  ;;  %vm1272_vm6 = vcmask 654336  }
  0x4f   : > { %v3649_v24 = vpack.c.bf16 %v555_v20, %v554_v18  ;;  %2607 = vmatprep.subr.bf16.mxu0 %v4067_v16  ;;  %2189 = vmatprep.mubr.msk.f32.mxu0 %vm3016_vm0, %v3017_v3  ;;  %v3655_v38 = vpack.c.bf16 %v573_v31, %v572_v0  ;;  %v575_v41 = vsub.f32 %v3291_v53, %v3309_v56 }
  0x50   : > { %v3663_v42 = vpack.c.bf16 %v561_v35, %v560_v32  ;;  %v562_v45 = vsub.f32 %v3314_v58, %v3327_v61  ;;  %v563_v46 = vsub.f32 %v3319_v60, %v3330_v62  ;;  %v576_v49 = vsub.f32 %v3344_v6, %v3359_v9  ;;  %v4096_v32 = vld [vmem:[#allocation21_spill] sm:$0xff]  ;;  %v878_v35 = vld [vmem:[%s4009_s4] sm:$0xff] }
  0x51   : > { %2603 = vmatpush3.bf16.msra.mxu1 %v3649_v24  ;;  %v3672_v48 = vpack.c.bf16 %v575_v41, %v574_v39  ;;  %v577_v50 = vsub.f32 %v3347_v7, %v3362_v10  ;;  %v564_v54 = vsub.f32 %v3372_v13, %v3390_v36  ;;  %v565_v56 = vsub.f32 %v3375_v29, %v3393_v37  ;;  %v4080_v13 = vld [vmem:[#allocation14_spill] sm:$0xff]  ;;  %v4081_v37 = vld [vmem:[#allocation16_spill] sm:$0xff]  ;;  %v1266_v41 = vld [vmem:[%s4011_s6] sm:$0xff] }
  0x52   : > { %2609 = vmatpush3.bf16.msra.mxu0 %v3643_v34  ;;  %2628 = vmatprep.subr.bf16.mxu1 %v4067_v16  ;;  %v3680_v53 = vpack.c.bf16 %v563_v46, %v562_v45  ;;  %v578_v60 = vsub.f32 %v3396_v43, %v3411_v57  ;;  %v579_v61 = vsub.f32 %v3403_v52, %v3421_v14  ;;  %v4082_v52 = vld [vmem:[#allocation17_spill] sm:$0xff]  ;;  %v3018_v39 = vmov 0   ;;  %v1646_v45 = vld [vmem:[%s4013_s8] sm:$0xff] }
  0x53   : > { %2610 = vmatprep.subr.bf16.mxu0 %v4067_v16  ;;  %v3690_v58 = vpack.c.bf16 %v577_v50, %v576_v49  ;;  %v3698_v62 = vpack.c.bf16 %v565_v56, %v564_v54  ;;  %v566_v6 = vsub.f32 %v3426_v15, %v3439_v12  ;;  %v567_v7 = vsub.f32 %v3431_v11, %v3442_v44  ;;  %v4085_v15 = vld [vmem:[#allocation20_spill] sm:$0xff]  ;;  %v4086_v12 = vld [vmem:[#allocation26_spill] sm:$0xff]  ;;  %v4087_v44 = vld [vmem:[#allocation23_spill] sm:$0xff] }
  0x54   : > { %2155 = vmatmul.mubr.f32.vlgmr.msra.gmra.mrb[0].mxu1 %v3586_v33  ;;  %v3706_v9 = vpack.c.bf16 %v579_v61, %v578_v60  ;;  %v580_v10 = vsub.f32 %v3456_v63, %v3472_v1  ;;  %v581_v29 = vsub.f32 %v4080_v13, %v3475_v59  ;;  %v568_v43 = vsub.f32 %v4081_v37, %v3503_v55  ;;  %v4083_v63 = vld [vmem:[#allocation22_spill] sm:$0xff]  ;;  %v4084_v59 = vld [vmem:[#allocation19_spill] sm:$0xff] }
  0x55   : > { %2630 = vmatpush3.bf16.msra.mxu1 %v3655_v38  ;;  %2224 = vmatprep.mubr.msk.f32.mxu1 %vm3016_vm0, %v3017_v3  ;;  %v3714_v36 = vpack.c.bf16 %v567_v7, %v566_v6  ;;  %v569_v57 = vsub.f32 %v4082_v52, %v3506_v5  ;;  %v582_v14 = vsub.f32 %v4084_v59, %v4083_v63  ;;  %v4098_v52 = vld [vmem:[#allocation9_spill] sm:$0xff]  ;;  %v4101_v59 = vld [vmem:[#allocation18_spill] sm:$0xff] }
  0x56   : > { %2612 = vmatpush3.bf16.msra.mxu0 %v3663_v42  ;;  %2631 = vmatprep.subr.bf16.mxu1 %v4067_v16  ;;  %v3722_v1 = vpack.c.bf16 %v581_v29, %v580_v10  ;;  %v583_v11 = vsub.f32 %v4085_v15, %v3538_v22  ;;  %v570_v5 = vsub.f32 %v4087_v44, %v4086_v12  ;;  %v876_v10 = vld [vmem:[%s4008_s3] sm:$0xf]  ;;  %v4100_v63 = vld [vmem:[#allocation13_spill] sm:$0xff] }
  0x57   : > { %2613 = vmatprep.subr.bf16.mxu0 %v4067_v16  ;;  %v3730_v55 = vpack.c.bf16 %v569_v57, %v568_v43  ;;  %v571_v28 = vsub.f32 %v4089_v8, %v4088_v4  ;;  %v584_v22 = vsub.f32 %v3576_v2, %v3594_v21  ;;  %v585_v47 = vsub.f32 %v3579_v23, %v3597_v51  ;;  %v4090_v2 = vld [vmem:[#allocation5_spill] sm:$0xff]  ;;  %v4091_v23 = vld [vmem:[#allocation6_spill] sm:$0xff]  ;;  %v4097_v43 = vld [vmem:[#allocation7_spill] sm:$0xff] }
  0x58   : > { %v3738_v18 = vpack.c.bf16 %v583_v11, %v582_v14  ;;  %v586_v31 = vsub.f32 %v3611_v27, %v3622_v19  ;;  %v587_v21 = vsub.f32 %v3614_v30, %v3627_v40  ;;  %v4092_v27 = vld [vmem:[#allocation8_spill] sm:$0xff]  ;;  %v4093_v30 = vld [vmem:[#allocation10_spill] sm:$0xff]  ;;  %v4095_v40 = vld [vmem:[#allocation15_spill] sm:$0xff]  ;;  %2946 = vset.pattern.permute.xlu0 %v3018_v39  ;;  %v877_v29 = vunpack.c.l.bf16 %v876_v10 }
  0x59   : > { %2633 = vmatpush3.bf16.msra.mxu1 %v3672_v48  ;;  %v3746_v20 = vpack.c.bf16 %v571_v28, %v570_v5  ;;  %v3750_v0 = vpack.c.bf16 %v585_v47, %v584_v22  ;;  %v4094_v19 = vld [vmem:[#allocation12_spill] sm:$0xff]  ;;  %881 = vperm.xlu0 %2946, %v878_v35   ;;  %v4099_v57 = vld [vmem:[#allocation11_spill] sm:$0xff]  ;;  %v4102_v14 = vld [vmem:[#allocation25_spill] sm:$0xff] }
  0x5a   : > { %2615 = vmatpush3.bf16.msra.mxu0 %v3680_v53  ;;  %2634 = vmatprep.subr.bf16.mxu1 %v4067_v16  ;;  %v3761_v51 = vpack.c.bf16 %v587_v21, %v586_v31  ;;  %v958_v15 = vld [vmem:[%s357_s28] sm:$0xf]  ;;  %s3963_s28 = scalar_lea.hbm %s4014_s9, %s1853_s23 }
  0x5b   : > { %2616 = vmatprep.subr.bf16.mxu0 %v4067_v16  ;;  %v959_v44 = vunpack.c.l.bf16 %v958_v15 }
  0x5d   : > { %2636 = vmatpush3.bf16.msra.mxu1 %v3690_v58  ;;  %1269 = vperm.xlu0 %2946, %v1266_v41  }
  0x5e   : > { %2618 = vmatpush3.bf16.msra.mxu0 %v3698_v62  ;;  %2637 = vmatprep.subr.bf16.mxu1 %v4067_v16 }
  0x5f   : > { %2619 = vmatprep.subr.bf16.mxu0 %v4067_v16 }
  0x61   : > { %2639 = vmatpush3.bf16.msra.mxu1 %v3706_v9  ;;  %1649 = vperm.xlu0 %2946, %v1646_v45   ;;  %v1264_v45 = vld [vmem:[%s4010_s5] sm:$0xf] }
  0x62   : > { %2621 = vmatpush3.bf16.msra.mxu0 %v3714_v36  ;;  %2640 = vmatprep.subr.bf16.mxu1 %v4067_v16 }
  0x63   : > { %2622 = vmatprep.subr.bf16.mxu0 %v4067_v16 }
  0x65   : > { %2642 = vmatpush3.bf16.msra.mxu1 %v3722_v1 }
  0x66   : > { %2624 = vmatpush3.bf16.msra.mxu0 %v3730_v55  ;;  %2643 = vmatprep.subr.bf16.mxu1 %v4067_v16 }
  0x67   : > { %2625 = vmatprep.subr.bf16.mxu0 %v4067_v16 }
  0x69   : > { %2645 = vmatpush3.bf16.msra.mxu1 %v3738_v18 }
  0x6a   : > { %2627 = vmatpush3.bf16.msra.mxu0 %v3746_v20  ;;  %2646 = vmatprep.subr.bf16.mxu1 %v4067_v16 }
  0x6b   : > { %2652 = vmatprep.subr.bf16.mxu0 %v4067_v16 }
  0x6d   : > { %2648 = vmatpush3.bf16.msra.mxu1 %v3750_v0  ;;  %2190 = vmatmul.mubr.f32.vlgmr.msra.gmra.mrb[2].mxu0 %v3586_v33 }
  0x6e   : > { %2649 = vmatprep.subr.bf16.mxu1 %v4067_v16  ;;  %2237 = vmatprep.mubr.msk.f32.mxu0 %vm3016_vm0, %v3017_v3 }
  0x71   : > { %2651 = vmatpush3.bf16.msra.mxu1 %v3761_v51 }
  0x72   : > { %2659 = vmatprep.subr.bf16.mxu1 %v4090_v2 }
  0x74   : > { %2225 = vmatmul.mubr.f32.vlgmr.msra.gmra.mrb[2].mxu1 %v3586_v33 }
  0x75   : > { %2661 = vmatpush3.bf16.msra.mxu1 %v4090_v2 }
  0x76   : > { %2663 = vmatprep.subr.bf16.mxu1 %v4091_v23 }
  0x79   : > { %2665 = vmatpush3.bf16.msra.mxu1 %v4091_v23 }
  0x7a   : > { %2667 = vmatprep.subr.bf16.mxu1 %v4092_v27 }
  0x7d   : > { %2669 = vmatpush3.bf16.msra.mxu1 %v4092_v27 }
  0x7e   : > { %2671 = vmatprep.subr.bf16.mxu1 %v4093_v30 }
  0x81   : > { %2673 = vmatpush3.bf16.msra.mxu1 %v4093_v30 }
  0x82   : > { %2675 = vmatprep.subr.bf16.mxu1 %v4094_v19 }
  0x85   : > { %2677 = vmatpush3.bf16.msra.mxu1 %v4094_v19 }
  0x86   : > { %2679 = vmatprep.subr.bf16.mxu1 %v4095_v40 }
  0x89   : > { %2681 = vmatpush3.bf16.msra.mxu1 %v4095_v40 }
  0x8a   : > { %2683 = vmatprep.subr.bf16.mxu1 %v4096_v32 }
  0x8d   : > { %2685 = vmatpush3.bf16.msra.mxu1 %v4096_v32 }
  0x8e   : > { %2687 = vmatprep.subr.bf16.mxu1 %v3590_v17 }
  0x91   : > { %2689 = vmatpush3.bf16.msra.mxu1 %v3590_v17 }
  0x92   : > { %2723 = vmatprep.subr.bf16.mxu1 %v3608_v25 }
  0xd8   : > { %v882_v11 = vpop.permute.xlu0 %881 }
 0x120   : > { %v660_v46 = vpop.f32.mrb[0].mxu0 }
 0x121   : > { %v2653_v49 = vpack.c.bf16 %v660_v46, %v3586_v33  ;;  %v2121_v50 = vpop.f32.mrb[1].mxu0  ;;  %v1265_v46 = vunpack.c.l.bf16 %v1264_v45 }
 0x123   : > { %2654 = vmatpush3.bf16.msra.mxu0 %v2653_v49  ;;  %v4103_v49 = vlaneseq }
 0x124   : > { %2655 = vmatprep.subr.bf16.mxu0 %v4067_v16 }
 0x125   : > { %v589_v50 = vand.u32 127, %v4103_v49 }
 0x127   : > { %v730_v54 = vpop.f32.mrb[0].mxu1  ;;  %vm590_vm7 = vcmp.lt.s32.totalorder %v589_v50, 16 }
 0x128   : > { %v2156_v56 = vpop.f32.mrb[1].mxu1 }
 0x140   : > { %v800_v60 = vpop.f32.mrb[2].mxu0 }
 0x141   : > { %v804_v61 = vand.u32 2147483647, %v800_v60  ;;  %v2191_v6 = vpop.f32.mrb[3].mxu0 }
 0x142   : > { %v3902_v6 = vsel %vm590_vm7, 1.0, %v3017_v3 }
 0x143   : > { %v2656_v7 = vpack.c.bf16 %v804_v61, %v730_v54  ;;  %v1270_v54 = vpop.permute.xlu0 %1269 }
 0x145   : > { %2657 = vmatpush3.bf16.msra.mxu0 %v2656_v7 }
 0x146   : > { %2235 = vmatprep.subr.mxu0 %v3017_v3 }
 0x147   : > { %v871_v13 = vpop.f32.mrb[2].mxu1 }
 0x148   : > { %v875_v33 = vand.u32 2147483647, %v871_v13  ;;  %v2226_v37 = vpop.f32.mrb[3].mxu1 }
 0x14a   : > { %2236 = vmatpush3.msra.mxu0 %v875_v33 }
 0x14b   : > { %2238 = vmatmul.mubr.msk.f32.vlgmr.msra.gmra.mrb[4].mxu0 %vm884_vm5, %v877_v29  ;;  %2691 = vmatprep.subr.bf16.mxu0 %v4097_v43 }
 0x14c   : > { %2693 = vmatpush3.bf16.msra.mxu0 %v4097_v43 }
 0x14d   : > { %2695 = vmatprep.subr.bf16.mxu0 %v4098_v52 }
 0x150   : > { %2697 = vmatpush3.bf16.msra.mxu0 %v4098_v52 }
 0x151   : > { %2699 = vmatprep.subr.bf16.mxu0 %v4099_v57 }
 0x154   : > { %2701 = vmatpush3.bf16.msra.mxu0 %v4099_v57 }
 0x155   : > { %2703 = vmatprep.subr.bf16.mxu0 %v4100_v63 }
 0x158   : > { %2705 = vmatpush3.bf16.msra.mxu0 %v4100_v63 }
 0x159   : > { %2707 = vmatprep.subr.bf16.mxu0 %v4101_v59 }
 0x15c   : > { %2709 = vmatpush3.bf16.msra.mxu0 %v4101_v59 }
 0x15d   : > { %2711 = vmatprep.subr.bf16.mxu0 %v4102_v14 }
 0x160   : > { %2713 = vmatpush3.bf16.msra.mxu0 %v4102_v14 }
 0x161   : > { %2715 = vmatprep.subr.bf16.mxu0 %v3617_v26 }
 0x164   : > { %2717 = vmatpush3.bf16.msra.mxu0 %v3617_v26 }
 0x165   : > { %2719 = vmatprep.subr.bf16.mxu0 %v3649_v24 }
 0x168   : > { %2721 = vmatpush3.bf16.msra.mxu0 %v3649_v24 }
 0x169   : > { %2755 = vmatprep.subr.bf16.mxu0 %v3655_v38 }
 0x21e   : > { %v954_v12 = vpop.f32.mrb[4].mxu0 }
 0x21f   : > { %v955_v5 = vadd.f32 %v954_v12, %v882_v11  ;;  %v2239_v4 = vpop.f32.mrb[5].mxu0 }
 0x221   : > { %2272 = vmatprep.mubr.f32.mxu1 %v955_v5  ;;  %2307 = vmatprep.mubr.f32.mxu0 %v955_v5  ;;  %v2787_v8 = vpack.c.bf16 %v959_v44, %v955_v5 }
 0x222   : > { %2273 = vmatmul.mubr.f32.vlgmr.msra.gmra.mrb[4].mxu1 %v959_v44  ;;  %2308 = vmatmul.mubr.f32.vlgmr.msra.gmra.mrb[6].mxu0 %v959_v44 }
 0x223   : > { %2725 = vmatpush3.bf16.msra.mxu1 %v3608_v25  ;;  %2342 = vmatprep.mubr.f32.mxu1 %v955_v5 }
 0x224   : > { %2377 = vmatprep.mubr.f32.mxu0 %v955_v5  ;;  %2727 = vmatprep.subr.bf16.mxu1 %v3643_v34 }
 0x225   : > { %2757 = vmatpush3.bf16.msra.mxu0 %v3655_v38 }
 0x226   : > { %2759 = vmatprep.subr.bf16.mxu0 %v3672_v48 }
 0x227   : > { %2729 = vmatpush3.bf16.msra.mxu1 %v3643_v34 }
 0x228   : > { %2731 = vmatprep.subr.bf16.mxu1 %v3663_v42 }
 0x229   : > { %2761 = vmatpush3.bf16.msra.mxu0 %v3672_v48 }
 0x22a   : > { %2763 = vmatprep.subr.bf16.mxu0 %v3690_v58 }
 0x22b   : > { %2733 = vmatpush3.bf16.msra.mxu1 %v3663_v42 }
 0x22c   : > { %2735 = vmatprep.subr.bf16.mxu1 %v3680_v53 }
 0x22d   : > { %2765 = vmatpush3.bf16.msra.mxu0 %v3690_v58 }
 0x22e   : > { %2767 = vmatprep.subr.bf16.mxu0 %v3706_v9 }
 0x22f   : > { %2737 = vmatpush3.bf16.msra.mxu1 %v3680_v53 }
 0x230   : > { %2739 = vmatprep.subr.bf16.mxu1 %v3698_v62 }
 0x231   : > { %2769 = vmatpush3.bf16.msra.mxu0 %v3706_v9 }
 0x232   : > { %2771 = vmatprep.subr.bf16.mxu0 %v3722_v1 }
 0x233   : > { %2741 = vmatpush3.bf16.msra.mxu1 %v3698_v62 }
 0x234   : > { %2743 = vmatprep.subr.bf16.mxu1 %v3714_v36 }
 0x235   : > { %2773 = vmatpush3.bf16.msra.mxu0 %v3722_v1 }
 0x236   : > { %2775 = vmatprep.subr.bf16.mxu0 %v3738_v18 }
 0x237   : > { %2745 = vmatpush3.bf16.msra.mxu1 %v3714_v36 }
 0x238   : > { %2747 = vmatprep.subr.bf16.mxu1 %v3730_v55 }
 0x239   : > { %2777 = vmatpush3.bf16.msra.mxu0 %v3738_v18 }
 0x23a   : > { %2779 = vmatprep.subr.bf16.mxu0 %v3750_v0 }
 0x23b   : > { %2749 = vmatpush3.bf16.msra.mxu1 %v3730_v55 }
 0x23c   : > { %2751 = vmatprep.subr.bf16.mxu1 %v3746_v20 }
 0x23d   : > { %2781 = vmatpush3.bf16.msra.mxu0 %v3750_v0 }
 0x23e   : > { %2783 = vmatprep.subr.bf16.mxu0 %v3761_v51 }
 0x23f   : > { %2753 = vmatpush3.bf16.msra.mxu1 %v3746_v20 }
 0x240   : > { %2786 = vmatprep.subr.bf16.mxu1 %v4067_v16 }
 0x241   : > { %2785 = vmatpush3.bf16.msra.mxu0 %v3761_v51 }
 0x242   : > { %2343 = vmatmul.mubr.f32.vlgmr.msra.gmra.mrb[6].mxu1 %v959_v44  ;;  %2801 = vmatprep.subr.bf16.mxu0 %v4067_v16 }
 0x243   : > { %2788 = vmatpush3.bf16.msra.mxu1 %v2787_v8  ;;  %2400 = vmatprep.mubr.msk.f32.mxu1 %vm3016_vm0, %v3017_v3 }
 0x244   : > { %2378 = vmatmul.mubr.f32.vlgmr.msra.gmra.mrb[8].mxu0 %v959_v44  ;;  %2789 = vmatprep.subr.bf16.mxu1 %v4067_v16 }
 0x245   : > { %2803 = vmatpush3.bf16.msra.mxu0 %v4090_v2  ;;  %2435 = vmatprep.mubr.msk.f32.mxu0 %vm3016_vm0, %v3017_v3 }
 0x246   : > { %2804 = vmatprep.subr.bf16.mxu0 %v4067_v16 }
 0x249   : > { %2806 = vmatpush3.bf16.msra.mxu0 %v4091_v23 }
 0x24a   : > { %2807 = vmatprep.subr.bf16.mxu0 %v4067_v16 }
 0x24d   : > { %2809 = vmatpush3.bf16.msra.mxu0 %v4092_v27 }
 0x24e   : > { %2810 = vmatprep.subr.bf16.mxu0 %v4067_v16 }
 0x251   : > { %2812 = vmatpush3.bf16.msra.mxu0 %v4093_v30 }
 0x252   : > { %2813 = vmatprep.subr.bf16.mxu0 %v4067_v16 }
 0x255   : > { %2815 = vmatpush3.bf16.msra.mxu0 %v4094_v19 }
 0x256   : > { %2816 = vmatprep.subr.bf16.mxu0 %v4067_v16 }
 0x259   : > { %2818 = vmatpush3.bf16.msra.mxu0 %v4095_v40 }
 0x25a   : > { %2819 = vmatprep.subr.bf16.mxu0 %v4067_v16 }
 0x25d   : > { %2821 = vmatpush3.bf16.msra.mxu0 %v4096_v32 }
 0x25e   : > { %2822 = vmatprep.subr.bf16.mxu0 %v4067_v16 }
 0x261   : > { %2824 = vmatpush3.bf16.msra.mxu0 %v3590_v17 }
 0x262   : > { %2849 = vmatprep.subr.bf16.mxu0 %v4067_v16 }
 0x2f5   : > { %v2274_v28 = vpop.f32.mrb[4].mxu1  ;;  %v2309_v22 = vpop.f32.mrb[6].mxu0 }
 0x2f6   : > { %v1026_v47 = vpop.f32.mrb[5].mxu1  ;;  %v1101_v31 = vpop.f32.mrb[7].mxu0 }
 0x2f7   : > { %v2790_v21 = vpack.c.bf16 %v2274_v28, %v1026_v47  ;;  %v2793_v2 = vpack.c.bf16 %v2309_v22, %v1101_v31 }
 0x2f9   : > { %2791 = vmatpush3.bf16.msra.mxu1 %v2790_v21 }
 0x2fa   : > { %2792 = vmatprep.subr.bf16.mxu1 %v4067_v16 }
 0x2fd   : > { %2794 = vmatpush3.bf16.msra.mxu1 %v2793_v2 }
 0x2fe   : > { %2795 = vmatprep.subr.bf16.mxu1 %v4067_v16 }
 0x315   : > { %v2344_v23 = vpop.f32.mrb[6].mxu1 }
 0x316   : > { %v1186_v27 = vand.u32 2147483647, %v2344_v23  ;;  %v1176_v30 = vpop.f32.mrb[7].mxu1 }
 0x317   : > { %v1185_v19 = vand.u32 2147483647, %v1176_v30  ;;  %v2379_v40 = vpop.f32.mrb[8].mxu0 }
 0x318   : > { %v1263_v17 = vand.u32 2147483647, %v2379_v40  ;;  %v1253_v32 = vpop.f32.mrb[9].mxu0 }
 0x319   : > { %v2796_v35 = vpack.c.bf16 %v1186_v27, %v1185_v19  ;;  %v1262_v39 = vand.u32 2147483647, %v1253_v32 }
 0x31b   : > { %v2799_v41 = vpack.c.bf16 %v1263_v17, %v1262_v39  ;;  %2797 = vmatpush3.bf16.msra.mxu1 %v2796_v35 }
 0x31c   : > { %2798 = vmatprep.subr.bf16.mxu1 %v4067_v16 }
 0x31f   : > { %2800 = vmatpush3.bf16.msra.mxu1 %v2799_v41 }
 0x320   : > { %2825 = vmatprep.subr.bf16.mxu1 %v4067_v16 }
 0x322   : > { %2401 = vmatmul.mubr.msk.f32.vlgmr.msra.gmra.mrb[8].mxu1 %vm1272_vm6, %v1265_v46 }
 0x323   : > { %2827 = vmatpush3.bf16.msra.mxu1 %v4097_v43  ;;  %2470 = vmatprep.mubr.msk.f32.mxu1 %vm3016_vm0, %v3017_v3 }
 0x324   : > { %2828 = vmatprep.subr.bf16.mxu1 %v4067_v16 }
 0x327   : > { %2830 = vmatpush3.bf16.msra.mxu1 %v4098_v52 }
 0x328   : > { %2831 = vmatprep.subr.bf16.mxu1 %v4067_v16 }
 0x32b   : > { %2833 = vmatpush3.bf16.msra.mxu1 %v4099_v57 }
 0x32c   : > { %2834 = vmatprep.subr.bf16.mxu1 %v4067_v16 }
 0x32f   : > { %2836 = vmatpush3.bf16.msra.mxu1 %v4100_v63 }
 0x330   : > { %2837 = vmatprep.subr.bf16.mxu1 %v4067_v16 }
 0x333   : > { %2839 = vmatpush3.bf16.msra.mxu1 %v4101_v59 }
 0x334   : > { %2840 = vmatprep.subr.bf16.mxu1 %v4067_v16 }
 0x337   : > { %2842 = vmatpush3.bf16.msra.mxu1 %v4102_v14 }
 0x338   : > { %2843 = vmatprep.subr.bf16.mxu1 %v4067_v16 }
 0x33b   : > { %2845 = vmatpush3.bf16.msra.mxu1 %v3617_v26 }
 0x33c   : > { %2846 = vmatprep.subr.bf16.mxu1 %v4067_v16 }
 0x33f   : > { %2848 = vmatpush3.bf16.msra.mxu1 %v3649_v24 }
 0x340   : > { %2873 = vmatprep.subr.bf16.mxu1 %v4067_v16 }
 0x3f5   : > { %v1342_v56 = vpop.f32.mrb[8].mxu1 }
 0x3f6   : > { %v1343_v60 = vadd.f32 %v1342_v56, %v1270_v54  ;;  %v2402_v61 = vpop.f32.mrb[9].mxu1 }
 0x3f8   : > { %v1346_v7 = vmax.f32 %v1343_v60, 0.0 }
 0x3fa   : > { %v1347_v10 = vmul.f32 %v1346_v7, %v3902_v6 }
 0x3fc   : > { %1348 = vadd.xlane.f32.xlu1 %v1347_v10  ;;  %v1351_v26 = vmul.f32 %v1347_v10, %v1347_v10 }
 0x400   : > { %1352 = vadd.xlane.f32.xlu1 %v1351_v26 }
 0x489   : > { %v1349_v13 = vpop.xlane.xlu1 %1348 }
 0x48a   : > { %v1350_v24 = vmul.f32 0.0625, %v1349_v13 }
 0x48c   : > { %v1355_v33 = vmul.f32 %v1350_v24, %v1350_v24  ;;  %v1358_v63 = vsub.f32 %v1346_v7, %v1350_v24 }
 0x48d   : > { %v1353_v29 = vpop.xlane.xlu1 %1352 }
 0x48e   : > { %v1354_v37 = vmul.f32 0.0625, %v1353_v29 }
 0x490   : > { %v1356_v43 = vsub.f32 %v1354_v37, %v1355_v33 }
 0x492   : > { %v1357_v52 = vmax.f32 %v1356_v43, 0.0 }
 0x494   : > { %v1359_v57 = vadd.f32 1e-05, %v1357_v52 }
 0x496   : > { %2947 = vrsqrt.f32 %v1359_v57 }
 0x4a0   : > { %v2948_v59 = vpop.eup %2947 }
 0x4a1   : > { %v3905_v14 = vmul.f32 %v2948_v59, %v1358_v63 }
 0x4a3   : > { %2436 = vmatmul.mubr.f32.vlgmr.msra.gmra.mrb[10].mxu0 %v3905_v14  ;;  %2471 = vmatmul.mubr.f32.vlgmr.msra.gmra.mrb[10].mxu1 %v3905_v14 }
 0x4a4   : > { %2851 = vmatpush3.bf16.msra.mxu0 %v3608_v25  ;;  %2875 = vmatpush3.bf16.msra.mxu1 %v3655_v38 }
 0x4a5   : > { %2852 = vmatprep.subr.bf16.mxu0 %v4067_v16  ;;  %2876 = vmatprep.subr.bf16.mxu1 %v4067_v16 }
 0x4a6   : > { %2505 = vmatprep.mubr.msk.f32.mxu0 %vm3016_vm0, %v3017_v3  ;;  %2540 = vmatprep.mubr.msk.f32.mxu1 %vm3016_vm0, %v3017_v3 }
 0x4a8   : > { %2854 = vmatpush3.bf16.msra.mxu0 %v3643_v34  ;;  %2878 = vmatpush3.bf16.msra.mxu1 %v3672_v48 }
 0x4a9   : > { %2855 = vmatprep.subr.bf16.mxu0 %v4067_v16  ;;  %2879 = vmatprep.subr.bf16.mxu1 %v4067_v16 }
 0x4ac   : > { %2857 = vmatpush3.bf16.msra.mxu0 %v3663_v42  ;;  %2881 = vmatpush3.bf16.msra.mxu1 %v3690_v58 }
 0x4ad   : > { %2858 = vmatprep.subr.bf16.mxu0 %v4067_v16  ;;  %2882 = vmatprep.subr.bf16.mxu1 %v4067_v16 }
 0x4b0   : > { %2860 = vmatpush3.bf16.msra.mxu0 %v3680_v53  ;;  %2884 = vmatpush3.bf16.msra.mxu1 %v3706_v9 }
 0x4b1   : > { %2861 = vmatprep.subr.bf16.mxu0 %v4067_v16  ;;  %2885 = vmatprep.subr.bf16.mxu1 %v4067_v16 }
 0x4b4   : > { %2863 = vmatpush3.bf16.msra.mxu0 %v3698_v62  ;;  %2887 = vmatpush3.bf16.msra.mxu1 %v3722_v1 }
 0x4b5   : > { %2864 = vmatprep.subr.bf16.mxu0 %v4067_v16  ;;  %2888 = vmatprep.subr.bf16.mxu1 %v4067_v16 }
 0x4b8   : > { %2866 = vmatpush3.bf16.msra.mxu0 %v3714_v36  ;;  %2890 = vmatpush3.bf16.msra.mxu1 %v3738_v18 }
 0x4b9   : > { %2867 = vmatprep.subr.bf16.mxu0 %v4067_v16  ;;  %2891 = vmatprep.subr.bf16.mxu1 %v4067_v16 }
 0x4bc   : > { %2869 = vmatpush3.bf16.msra.mxu0 %v3730_v55  ;;  %2893 = vmatpush3.bf16.msra.mxu1 %v3750_v0  ;;  %v1644_v55 = vld [vmem:[%s4012_s7] sm:$0xf]  ;;  %v1650_v0 = vpop.permute.xlu0 %1649 }
 0x4bd   : > { %2870 = vmatprep.subr.bf16.mxu0 %v4067_v16  ;;  %2894 = vmatprep.subr.bf16.mxu1 %v4067_v16  ;;  %v1645_v18 = vunpack.c.l.bf16 %v1644_v55 }
 0x4c0   : > { %2872 = vmatpush3.bf16.msra.mxu0 %v3746_v20  ;;  %2896 = vmatpush3.bf16.msra.mxu1 %v3761_v51 }
 0x4c1   : > { %2897 = vmatprep.subr.bf16.mxu0 %v4067_v16 }
 0x4c3   : > { %2506 = vmatmul.mubr.f32.vlgmr.msra.gmra.mrb[12].mxu0 %v3905_v14  ;;  %2541 = vmatmul.mubr.f32.vlgmr.msra.gmra.mrb[12].mxu1 %v3905_v14 }
 0x4c4   : > { %2553 = vmatprep.mubr.msk.f32.mxu0 %vm3016_vm0, %v3017_v3 }
 0x576   : > { %v1428_v25 = vpop.f32.mrb[10].mxu0  ;;  %v1498_v34 = vpop.f32.mrb[10].mxu1 }
 0x577   : > { %v2898_v38 = vpack.c.bf16 %v1428_v25, %v3905_v14  ;;  %v2437_v42 = vpop.f32.mrb[11].mxu0  ;;  %v2472_v48 = vpop.f32.mrb[11].mxu1 }
 0x579   : > { %2899 = vmatpush3.bf16.msra.mxu0 %v2898_v38 }
 0x57a   : > { %2900 = vmatprep.subr.bf16.mxu0 %v4067_v16 }
 0x596   : > { %v1568_v53 = vpop.f32.mrb[12].mxu0  ;;  %v1639_v58 = vpop.f32.mrb[12].mxu1 }
 0x597   : > { %v1572_v62 = vand.u32 2147483647, %v1568_v53  ;;  %v2507_v9 = vpop.f32.mrb[13].mxu0  ;;  %v2542_v36 = vpop.f32.mrb[13].mxu1  ;;  %v1643_v20 = vand.u32 2147483647, %v1639_v58 }
 0x599   : > { %v2901_v1 = vpack.c.bf16 %v1572_v62, %v1498_v34 }
 0x59b   : > { %2902 = vmatpush3.bf16.msra.mxu0 %v2901_v1 }
 0x59c   : > { %2551 = vmatprep.subr.mxu0 %v3017_v3 }
 0x59f   : > { %2552 = vmatpush3.msra.mxu0 %v1643_v20 }
 0x5a0   : > { %2554 = vmatmul.mubr.msk.f32.vlgmr.msra.gmra.mrb[14].mxu0 %vm884_vm5, %v1645_v18 }
 0x673   : > { %v1721_v16 = vpop.f32.mrb[14].mxu0 }
 0x674   : > { %v1722_v51 = vadd.f32 %v1721_v16, %v1650_v0  ;;  %v2555_v15 = vpop.f32.mrb[15].mxu0 }
 0x676   : > { %v1725_v11 = vmax.f32 %v1722_v51, 0.0 }
 0x678   : > { %v1726_v12 = vmul.f32 %v1725_v11, %v3902_v6 }
 0x67a   : > { %1727 = vadd.xlane.f32.xlu1 %v1726_v12  ;;  %v1730_v44 = vmul.f32 %v1726_v12, %v1726_v12 }
 0x67c   : > { %1731 = vadd.xlane.f32.xlu0 %v1730_v44 }
 0x707   : > { %v1728_v5 = vpop.xlane.xlu1 %1727 }
 0x708   : > { %v1729_v4 = vmul.f32 0.0625, %v1728_v5 }
 0x709   : > { %v1732_v3 = vpop.xlane.xlu0 %1731 }
 0x70a   : > { %v1734_v8 = vmul.f32 %v1729_v4, %v1729_v4  ;;  %v1733_v28 = vmul.f32 0.0625, %v1732_v3  ;;  %v1737_v21 = vsub.f32 %v1725_v11, %v1729_v4 }
 0x70c   : > { %v1735_v22 = vsub.f32 %v1733_v28, %v1734_v8 }
 0x70e   : > { %v1736_v47 = vmax.f32 %v1735_v22, 0.0 }
 0x710   : > { %v1738_v31 = vadd.f32 1e-05, %v1736_v47 }
 0x712   : > { %2949 = vrsqrt.f32 %v1738_v31 }
 0x71c   : > { %v2950_v2 = vpop.eup %2949 }
 0x71d   : > { %v1740_v23 = vmul.f32 %v2950_v2, %v1737_v21 }
 0x71f   : > { %v1741_v27 = vadd.f32 %v1740_v23, %v3905_v14 }
 0x721   : > { %v1742_v30 = vmul.f32 %v1741_v27, %v3902_v6 }
 0x723   : > { %1743 = vst [vmem:[%s349_s24] sm:$0xff] %v1742_v30 }
 0x724   : > { %2964 = shalt.err (!%p2961_p3)
}
 0x725   : > { %s2965_s17 = scalar_lea.hbm %s3963_s28, 128  ;;  %s2969_s24 = scalar_lea.hbm %s4014_s9, 256 }
 0x726   : > { %p2966_p4 = scmp.ne.s32.totalorder %s3963_s28, %s2965_s17  ;;  %p2970_p9 = scmp.lt.u32.totalorder %s3963_s28, %s4014_s9 }
 0x727   : > { %p2971_p10 = scmp.lt.u32.totalorder %s2969_s24, %s2965_s17  ;;  %p2973_p12 = scmp.lt.u32.totalorder %s2965_s17, %s3963_s28 }
 0x728   : > { %p2967_p7 = pnand %p2966_p4, %p3108_p5 }
 0x729   : > { %p2972_p11 = por %p2971_p10, %p2970_p9 }
 0x72a   : > { %p2968_p8 = pneg %p2967_p7 }
 0x72b   : > { %p2974_p13 = por %p2973_p12, %p2972_p11 }
 0x72d   : > { %p2975_p0 = pnand %p2974_p13, %p2968_p8 }
 0x72f   : > { %2978 = shalt.err (!%p2975_p0)
}
 0x730   : > { %2903 = dma.vmem_to_hbm [thread:$0]  (%p3108_p5), %s3965_s25, 128, %s3963_s28, %s1745_s22  }
 0x731 PF: > { %p2909_p1 = scmp.ge.s32.totalorder %s3013_s12, 2  ;;  %s1770_s29 = sand.u32 1, %s3001_s30  }
 0x732   : > { %s1771_s13 = scalar_lea.sflag [#allocation3], %s1770_s29 }
 0x733   : > { %p2906_p2 = pnand %p2909_p1, %p3112_p6 }
 0x735   : > { %2996 = dma.done.wait (!%p2906_p2), %s1771_s13, 128  }
 0x736   : > { %2998 = vsyncadd (!%p2906_p2), %s1771_s13, 4294967168  ;;  %p19_p3 = scmp.ge.s32.totalorder %s3095_s15, 4   ;;  %s4104_s30 = smov %s3005_s10 }
 0x737   : > { %s4105_s10 = smov %s3009_s11  ;;  %s4106_s11 = smov %s3106_s18 }
 0x738   : > { %s4107_s12 = smov %s3095_s15  ;;  %21 = sbr.rel (!%p19_p3) target bundleno = 3 (0x3), region = 97 }
 0x73f   :  { %1776 = vsyncpa [#allocation3], 1 }
 0x740   :  { %1778 = vsyncpa [#allocation3 + $0x1], 1 }

</bundles_post_ra>
